<compile_context>
chip_gen: v6e
topology: v6e:2x2x1
jax: 0.10.0
libtpu: 0.0.40
codegen_flags: <defaults>
</compile_context>

<pallas_src>
import functools

import jax
import jax.numpy as jnp
from jax.experimental import pallas as pl
from jax.experimental.pallas import tpu as pltpu


def _round_up(v, m):
    return ((v + m - 1) // m) * m


# -----------------------------------------------------------------------------
# Pallas kernels
# -----------------------------------------------------------------------------
def _gemm_bias_act_kernel(x_ref, w_ref, b_ref, o_ref, *, relu, lrn):
    """out = lrn(relu(x @ w + b)); x/w are bf16 tiles, accumulate in f32."""
    y = jnp.dot(x_ref[...], w_ref[...], preferred_element_type=jnp.float32)
    y = y + b_ref[...]                                  # (1, Np) broadcast
    if relu:
        y = jnp.maximum(y, 0.0)
    if lrn:
        # torch F.local_response_norm(size=2, alpha=1e-4, beta=0.75, k=2):
        #   div[c] = (sq[c-1] + sq[c]) / 2     (sq[-1] == 0)
        #   out    = y / (k + alpha * div) ** beta
        alpha, beta, k = 1e-4, 0.75, 2.0
        sq = y * y
        prev = pltpu.roll(sq, 1, 1)                     # lane shift -> sq[c-1]
        lane = jax.lax.broadcasted_iota(jnp.int32, sq.shape, 1)
        prev = jnp.where(lane == 0, 0.0, prev)          # zero-pad channel -1
        d = 0.5 * (sq + prev) * alpha + k
        y = y / jnp.exp(beta * jnp.log(d))              # d**beta via EUP exp/log
    o_ref[...] = y.astype(o_ref.dtype)


def _fc_tail_kernel(x_ref, w6_ref, b6_ref, m1_ref, w7_ref, b7_ref, m2_ref,
                    w8_ref, b8_ref, wh_ref, bh_ref, wc_ref, bc_ref,
                    hash_ref, cls_ref):
    """Fused fc6 -> drop -> fc7 -> drop -> fc8 -> hash -> classifier.

    All activations stay resident in VMEM/vregs; 5 chained bf16 MXU matmuls
    with f32 accumulation. Dropout masks (already scaled) are passed in."""
    f32 = jnp.float32
    bf16 = jnp.bfloat16

    y = jnp.dot(x_ref[...], w6_ref[...], preferred_element_type=f32) + b6_ref[...]
    y = jnp.maximum(y, 0.0) * m1_ref[...]                      # fc6 + ReLU + dropout

    y = jnp.dot(y.astype(bf16), w7_ref[...], preferred_element_type=f32) + b7_ref[...]
    y = jnp.maximum(y, 0.0) * m2_ref[...]                      # fc7 + ReLU + dropout

    y = jnp.dot(y.astype(bf16), w8_ref[...], preferred_element_type=f32) + b8_ref[...]
    y = jnp.maximum(y, 0.0)                                    # fc8 + ReLU

    h = jnp.dot(y.astype(bf16), wh_ref[...], preferred_element_type=f32) + bh_ref[...]
    hash_ref[...] = h                                          # hash layer (no act)

    c = jnp.dot(h.astype(bf16), wc_ref[...], preferred_element_type=f32) + bc_ref[...]
    cls_ref[...] = c                                           # classifier


# -----------------------------------------------------------------------------
# Pallas wrappers
# -----------------------------------------------------------------------------
def pallas_gemm_bias_act(xcol, w_p, b_p, *, relu, lrn):
    """xcol: (M, K) f32; w_p: (Kp, Np) bf16 pre-packed; b_p: (1, Np) f32."""
    M, K = xcol.shape
    Kp, Np = w_p.shape

    if M >= 512:
        tm = 256        # grid over M; "parallel" -> both v7x TensorCores busy
    else:
        tm = _round_up(max(M, 8), 8)
    Mp = _round_up(M, tm)

    xp = jnp.pad(xcol, ((0, Mp - M), (0, Kp - K))).astype(jnp.bfloat16)

    out = pl.pallas_call(
        functools.partial(_gemm_bias_act_kernel, relu=relu, lrn=lrn),
        out_shape=jax.ShapeDtypeStruct((Mp, Np), jnp.float32),
        grid=(Mp // tm,),
        in_specs=[
            pl.BlockSpec((tm, Kp), lambda i: (i, 0)),
            pl.BlockSpec((Kp, Np), lambda i: (0, 0)),
            pl.BlockSpec((1, Np), lambda i: (0, 0)),
        ],
        out_specs=pl.BlockSpec((tm, Np), lambda i: (i, 0)),
        compiler_params=pltpu.CompilerParams(dimension_semantics=("parallel",)),
    )(xp, w_p, b_p)
    return out[:M]


def pallas_fc_tail(xcol, packed, dk1, dk2, drop_p):
    """Single pallas_call running fc6..classifier with in-VMEM activations."""
    M, K = xcol.shape
    w6, b6 = packed["fc6"]["w"], packed["fc6"]["b"]
    w7, b7 = packed["fc7"]["w"], packed["fc7"]["b"]
    w8, b8 = packed["fc8"]["w"], packed["fc8"]["b"]
    wh, bh = packed["hash"]["w"], packed["hash"]["b"]
    wc, bc = packed["cls"]["w"], packed["cls"]["b"]

    Kp = w6.shape[0]
    Mp = _round_up(max(M, 8), 8)
    xp = jnp.pad(xcol, ((0, Mp - M), (0, Kp - K))).astype(jnp.bfloat16)

    # Matches PyTorch F.dropout(x, p=self.keep_prob) exactly (training=True):
    # DROP with probability keep_prob, scale survivors by 1/(1-keep_prob).
    scale = 1.0 / (1.0 - drop_p)
    m1 = jax.random.bernoulli(dk1, 1.0 - drop_p, (Mp, w6.shape[1])
                              ).astype(jnp.float32) * scale
    m2 = jax.random.bernoulli(dk2, 1.0 - drop_p, (Mp, w7.shape[1])
                              ).astype(jnp.float32) * scale

    hash_p, cls_p = pl.pallas_call(
        _fc_tail_kernel,
        out_shape=(jax.ShapeDtypeStruct((Mp, wh.shape[1]), jnp.float32),
                   jax.ShapeDtypeStruct((Mp, wc.shape[1]), jnp.float32)),
    )(xp, w6, b6, m1, w7, b7, m2, w8, b8, wh, bh, wc, bc)
    return hash_p[:M], cls_p[:M]


# -----------------------------------------------------------------------------
# Plain-JAX glue (im2col slicing, max-pool). Cheap at these shapes.
# -----------------------------------------------------------------------------
def im2col_nhwc(x, kh, kw, stride, pad):
    """x: (N, H, W, C) -> (N*OH*OW, kh*kw*C), K flattened in (kh, kw, C) order."""
    top, bot, left, right = pad
    xp = jnp.pad(x, ((0, 0), (top, bot), (left, right), (0, 0)))
    N, Hp, Wp, C = xp.shape
    OH = (Hp - kh) // stride + 1
    OW = (Wp - kw) // stride + 1
    cols = [
        xp[:, i: i + stride * OH: stride, j: j + stride * OW: stride, :]
        for i in range(kh) for j in range(kw)
    ]
    xcol = jnp.concatenate(cols, axis=-1)            # (N, OH, OW, kh*kw*C)
    return xcol.reshape(N * OH * OW, kh * kw * C), OH, OW


def conv_block(x_nhwc, layer, cout, *, kh, kw, stride, pad, relu, lrn):
    N = x_nhwc.shape[0]
    xcol, OH, OW = im2col_nhwc(x_nhwc, kh, kw, stride, pad)
    y = pallas_gemm_bias_act(xcol, layer["w"], layer["b"], relu=relu, lrn=lrn)
    return y[:, :cout].reshape(N, OH, OW, cout)


def max_pool_nhwc(x, ksize, stride, pad):
    # F.pad with zeros then max-pool, exactly as the PyTorch forward does.
    top, bot, left, right = pad
    xp = jnp.pad(x, ((0, 0), (top, bot), (left, right), (0, 0)))
    return jax.lax.reduce_window(
        xp, -jnp.inf, jax.lax.max,
        window_dimensions=(1, ksize[0], ksize[1], 1),
        window_strides=(1, stride[0], stride[1], 1),
        padding="VALID",
    )


# -----------------------------------------------------------------------------
# Parameters: torch-layout init + one-time packing for the Pallas kernels
# -----------------------------------------------------------------------------
def init_params(key, *, in_ch=3, hw=32, feature=32, bit=16, n_class=10, n_fc7=64):
    ks = jax.random.split(key, 16)

    def conv_w(k, o, i, kh, kw):
        return jax.random.normal(k, (o, i, kh, kw), jnp.float32) * 0.05

    return {
        "mean": jax.random.normal(ks[0], (in_ch, hw, hw), jnp.float32) * 0.1,
        "conv1_w": conv_w(ks[1], 16, in_ch, 3, 3), "conv1_b": jnp.zeros((16,), jnp.float32),
        "conv2_w": conv_w(ks[2], 32, 16, 3, 3),    "conv2_b": jnp.zeros((32,), jnp.float32),
        "conv3_w": conv_w(ks[3], 32, 32, 3, 3),    "conv3_b": jnp.zeros((32,), jnp.float32),
        "conv4_w": conv_w(ks[4], 32, 32, 3, 3),    "conv4_b": jnp.zeros((32,), jnp.float32),
        "conv5_w": conv_w(ks[5], 32, 32, 3, 3),    "conv5_b": jnp.zeros((32,), jnp.float32),
        "fc6_w": conv_w(ks[6], n_fc7, 32, 2, 2),   "fc6_b": jnp.zeros((n_fc7,), jnp.float32),
        "fc7_w": conv_w(ks[7], n_fc7, n_fc7, 1, 1),"fc7_b": jnp.zeros((n_fc7,), jnp.float32),
        "fc8_w": conv_w(ks[8], feature, n_fc7, 1, 1), "fc8_b": jnp.zeros((feature,), jnp.float32),
        "hash_w": conv_w(ks[9], bit, feature, 1, 1),  "hash_b": jnp.zeros((bit,), jnp.float32),
        "cls_w": conv_w(ks[10], n_class, bit, 1, 1),  "cls_b": jnp.zeros((n_class,), jnp.float32),
    }


def prepare_params(params):
    """One-time pack: transpose to im2col K-order, pad to 128-multiples, bf16."""
    def pack(wname, bname):
        w = params[wname].astype(jnp.float32)
        b = params[bname].astype(jnp.float32)
        O, C, kh, kw = w.shape
        K = kh * kw * C
        Kp = _round_up(max(K, 128), 128)
        Np = _round_up(max(O, 128), 128)
        # torch (O, C, kh, kw) -> (kh, kw, C, O) -> (K, O): matches im2col order.
        wmat = jnp.transpose(w, (2, 3, 1, 0)).reshape(K, O)
        wmat = jnp.pad(wmat, ((0, Kp - K), (0, Np - O))).astype(jnp.bfloat16)
        bias = jnp.pad(b, (0, Np - O)).reshape(1, Np)
        return {"w": wmat, "b": bias}

    return {
        "mean_hwc": jnp.transpose(params["mean"], (1, 2, 0)).astype(jnp.float32),
        "conv1": pack("conv1_w", "conv1_b"),
        "conv2": pack("conv2_w", "conv2_b"),
        "conv3": pack("conv3_w", "conv3_b"),
        "conv4": pack("conv4_w", "conv4_b"),
        "conv5": pack("conv5_w", "conv5_b"),
        "fc6": pack("fc6_w", "fc6_b"),
        "fc7": pack("fc7_w", "fc7_b"),
        "fc8": pack("fc8_w", "fc8_b"),
        "hash": pack("hash_w", "hash_b"),
        "cls": pack("cls_w", "cls_b"),
    }


# -----------------------------------------------------------------------------
# Forward pass (matches the PyTorch ImageNet.forward semantics)
# -----------------------------------------------------------------------------
def imagenet_forward(packed, x, dropout_key, *, cfg, keep_prob):
    dk1, dk2 = jax.random.split(dropout_key)

    # NCHW -> NHWC once; channels live on the lane dim for every layer below.
    x = jnp.transpose(x, (0, 2, 3, 1)) - packed["mean_hwc"]

    # conv1 + ReLU + LRN (fused into the GEMM epilogue) ; pool1
    x = conv_block(x, packed["conv1"], cfg["c1"],
                   kh=3, kw=3, stride=2, pad=(1, 1, 1, 1), relu=True, lrn=True)
    x = max_pool_nhwc(x, (2, 2), (2, 2), (0, 0, 0, 0))

    # conv2 + ReLU + LRN ; pool2
    x = conv_block(x, packed["conv2"], cfg["c2"],
                   kh=3, kw=3, stride=1, pad=(1, 1, 1, 1), relu=True, lrn=True)
    x = max_pool_nhwc(x, (2, 2), (2, 2), (0, 0, 0, 0))

    # conv3 / conv4 / conv5 + ReLU ; pool5
    x = conv_block(x, packed["conv3"], cfg["c3"],
                   kh=3, kw=3, stride=1, pad=(1, 1, 1, 1), relu=True, lrn=False)
    x = conv_block(x, packed["conv4"], cfg["c4"],
                   kh=3, kw=3, stride=1, pad=(1, 1, 1, 1), relu=True, lrn=False)
    x = conv_block(x, packed["conv5"], cfg["c5"],
                   kh=3, kw=3, stride=1, pad=(1, 1, 1, 1), relu=True, lrn=False)
    x = max_pool_nhwc(x, (2, 2), (2, 2), (0, 0, 0, 0))

    # Fused tail: fc6(2x2) -> dropout -> fc7 -> dropout -> fc8 -> hash -> cls
    xcol, _, _ = im2col_nhwc(x, 2, 2, 1, (0, 0, 0, 0))      # (N, 2*2*C)
    hash_p, cls_p = pallas_fc_tail(xcol, packed, dk1, dk2, keep_prob)

    hashcode = hash_p[:, : cfg["bit"]]          # == hashcode.squeeze()
    class_pred = cls_p[:, : cfg["n_class"]]     # == class_pred.squeeze()
    return hashcode, class_pred


if __name__ == "__main__":
    # Small, deterministic configuration (bit=16, feature=32, n_class=10, n_fc7=64).
    batch, in_ch, hw = 2, 3, 32
    keep_prob = 0.5
    cfg = dict(c1=16, c2=32, c3=32, c4=32, c5=32,
               n_fc7=64, feature=32, bit=16, n_class=10)

    key = jax.random.PRNGKey(0)
    k_params, k_input, k_drop = jax.random.split(key, 3)

    params = init_params(k_params, in_ch=in_ch, hw=hw, feature=cfg["feature"],
                         bit=cfg["bit"], n_class=cfg["n_class"], n_fc7=cfg["n_fc7"])
    packed = prepare_params(params)   # pack/pad/bf16-cast weights once, not per call
    x = jax.random.normal(k_input, (batch, in_ch, hw, hw), jnp.float32)

    fwd = jax.jit(functools.partial(imagenet_forward, cfg=cfg, keep_prob=keep_prob))
    hashcode, class_pred = fwd(packed, x, k_drop)
    jax.block_until_ready((hashcode, class_pred))

    assert hashcode.shape == (batch, cfg["bit"]), hashcode.shape
    assert class_pred.shape == (batch, cfg["n_class"]), class_pred.shape
    print("KERNEL_OK")
</pallas_src>

<mosaic_0001>
module attributes {stable_mosaic.version = 11 : i64} {
  func.func @_gemm_bias_act_kernel(%arg0: i32, %arg1: memref<256x128xbf16, #tpu.memory_space<vmem>>, %arg2: memref<128x128xbf16, #tpu.memory_space<vmem>>, %arg3: memref<1x128xf32, #tpu.memory_space<vmem>>, %arg4: memref<256x128xf32, #tpu.memory_space<vmem>>) attributes {dimension_semantics = [#tpu.dimension_semantics<parallel>], iteration_bounds = array<i64: 2>, scalar_prefetch = 0 : i64, scratch_operands = 0 : i64, tpu.core_type = #tpu.core_type<tc>, window_params = [{transform_indices = @transform_0, window_bounds = array<i64: 256, 128>}, {pipeline_mode = #tpu.pipeline_mode<synchronous>, transform_indices = @transform_1, window_bounds = array<i64: 128, 128>}, {pipeline_mode = #tpu.pipeline_mode<synchronous>, transform_indices = @transform_2, window_bounds = array<i64: 1, 128>}, {transform_indices = @transform_3, window_bounds = array<i64: 256, 128>}]} {
    %c0 = arith.constant 0 : index
    %c0_0 = arith.constant 0 : index
    %0 = vector.load %arg1[%c0, %c0_0] : memref<256x128xbf16, #tpu.memory_space<vmem>>, vector<256x128xbf16>
    %c0_1 = arith.constant 0 : index
    %c0_2 = arith.constant 0 : index
    %1 = vector.load %arg2[%c0_1, %c0_2] : memref<128x128xbf16, #tpu.memory_space<vmem>>, vector<128x128xbf16>
    %cst = arith.constant dense<0.000000e+00> : vector<256x128xf32>
    %2 = tpu.matmul %0, %1, %cst {dimension_numbers = #tpu.dot_dimension_numbers<[1], [0], [0], [1], [0, 0, 1, 1], [], []>} : vector<256x128xbf16>, vector<128x128xbf16>, vector<256x128xf32> -> vector<256x128xf32>
    %c0_3 = arith.constant 0 : index
    %c0_4 = arith.constant 0 : index
    %3 = vector.load %arg3[%c0_3, %c0_4] : memref<1x128xf32, #tpu.memory_space<vmem>>, vector<1x128xf32>
    %4 = vector.broadcast %3 : vector<1x128xf32> to vector<256x128xf32>
    %5 = arith.addf %2, %4 : vector<256x128xf32>
    %cst_5 = arith.constant 0.000000e+00 : f32
    %6 = vector.broadcast %cst_5 : f32 to vector<256x128xf32>
    %7 = arith.maximumf %5, %6 : vector<256x128xf32>
    %8 = arith.mulf %7, %7 : vector<256x128xf32>
    %c1_i32 = arith.constant 1 : i32
    %9 = tpu.dynamic_rotate %8 by %c1_i32 dim 1 : vector<256x128xf32>, i32 -> vector<256x128xf32>
    %10 = tpu.iota {dimensions = array<i32: 1>} : vector<256x128xi32>
    %c0_i32 = arith.constant 0 : i32
    %11 = vector.broadcast %c0_i32 : i32 to vector<256x128xi32>
    %12 = arith.cmpi eq, %10, %11 : vector<256x128xi32>
    %cst_6 = arith.constant 0.000000e+00 : f32
    %13 = vector.broadcast %cst_6 : f32 to vector<256x128xf32>
    %14 = arith.select %12, %13, %9 : vector<256x128xi1>, vector<256x128xf32>
    %15 = arith.addf %8, %14 : vector<256x128xf32>
    %cst_7 = arith.constant 5.000000e-01 : f32
    %16 = vector.broadcast %cst_7 : f32 to vector<256x128xf32>
    %17 = arith.mulf %16, %15 : vector<256x128xf32>
    %cst_8 = arith.constant 9.99999974E-5 : f32
    %18 = vector.broadcast %cst_8 : f32 to vector<256x128xf32>
    %19 = arith.mulf %17, %18 : vector<256x128xf32>
    %cst_9 = arith.constant 2.000000e+00 : f32
    %20 = vector.broadcast %cst_9 : f32 to vector<256x128xf32>
    %21 = arith.addf %19, %20 : vector<256x128xf32>
    %22 = math.log %21 : vector<256x128xf32>
    %cst_10 = arith.constant 7.500000e-01 : f32
    %23 = vector.broadcast %cst_10 : f32 to vector<256x128xf32>
    %24 = arith.mulf %23, %22 : vector<256x128xf32>
    %25 = math.exp %24 : vector<256x128xf32>
    %26 = arith.divf %7, %25 : vector<256x128xf32>
    %c0_11 = arith.constant 0 : index
    %c0_12 = arith.constant 0 : index
    %27 = vector.load %arg4[%c0_11, %c0_12] : memref<256x128xf32, #tpu.memory_space<vmem>>, vector<256x128xf32>
    tpu.vector_store %arg4[%c0_11, %c0_12], %26 {strides = array<i32>} : memref<256x128xf32, #tpu.memory_space<vmem>>, vector<256x128xf32>,
    return
  }
  func.func @transform_0(%arg0: i32) -> (i32, i32) {
    %c0_i32 = arith.constant 0 : i32
    %c0_i32_0 = arith.constant 0 : i32
    return %arg0, %c0_i32 : i32, i32
  }
  func.func @transform_1(%arg0: i32) -> (i32, i32) {
    %c0_i32 = arith.constant 0 : i32
    %c0_i32_0 = arith.constant 0 : i32
    %c0_i32_1 = arith.constant 0 : i32
    return %c0_i32, %c0_i32_0 : i32, i32
  }
  func.func @transform_2(%arg0: i32) -> (i32, i32) {
    %c0_i32 = arith.constant 0 : i32
    %c0_i32_0 = arith.constant 0 : i32
    %c0_i32_1 = arith.constant 0 : i32
    return %c0_i32, %c0_i32_0 : i32, i32
  }
  func.func @transform_3(%arg0: i32) -> (i32, i32) {
    %c0_i32 = arith.constant 0 : i32
    %c0_i32_0 = arith.constant 0 : i32
    return %arg0, %c0_i32 : i32, i32
  }
}

module attributes {stable_mosaic.version = 11 : i64} {
  func.func @_gemm_bias_act_kernel(%arg0: i32, %arg1: memref<128x256xbf16, #tpu.memory_space<vmem>>, %arg2: memref<256x128xbf16, #tpu.memory_space<vmem>>, %arg3: memref<1x128xf32, #tpu.memory_space<vmem>>, %arg4: memref<128x128xf32, #tpu.memory_space<vmem>>) attributes {dimension_semantics = [#tpu.dimension_semantics<parallel>], iteration_bounds = array<i64: 1>, scalar_prefetch = 0 : i64, scratch_operands = 0 : i64, tpu.core_type = #tpu.core_type<tc>, window_params = [{transform_indices = @transform_0, window_bounds = array<i64: 128, 256>}, {pipeline_mode = #tpu.pipeline_mode<synchronous>, transform_indices = @transform_1, window_bounds = array<i64: 256, 128>}, {pipeline_mode = #tpu.pipeline_mode<synchronous>, transform_indices = @transform_2, window_bounds = array<i64: 1, 128>}, {transform_indices = @transform_3, window_bounds = array<i64: 128, 128>}]} {
    %c0 = arith.constant 0 : index
    %c0_0 = arith.constant 0 : index
    %0 = vector.load %arg1[%c0, %c0_0] : memref<128x256xbf16, #tpu.memory_space<vmem>>, vector<128x256xbf16>
    %c0_1 = arith.constant 0 : index
    %c0_2 = arith.constant 0 : index
    %1 = vector.load %arg2[%c0_1, %c0_2] : memref<256x128xbf16, #tpu.memory_space<vmem>>, vector<256x128xbf16>
    %cst = arith.constant dense<0.000000e+00> : vector<128x128xf32>
    %2 = tpu.matmul %0, %1, %cst {dimension_numbers = #tpu.dot_dimension_numbers<[1], [0], [0], [1], [0, 0, 1, 1], [], []>} : vector<128x256xbf16>, vector<256x128xbf16>, vector<128x128xf32> -> vector<128x128xf32>
    %c0_3 = arith.constant 0 : index
    %c0_4 = arith.constant 0 : index
    %3 = vector.load %arg3[%c0_3, %c0_4] : memref<1x128xf32, #tpu.memory_space<vmem>>, vector<1x128xf32>
    %4 = vector.broadcast %3 : vector<1x128xf32> to vector<128x128xf32>
    %5 = arith.addf %2, %4 : vector<128x128xf32>
    %cst_5 = arith.constant 0.000000e+00 : f32
    %6 = vector.broadcast %cst_5 : f32 to vector<128x128xf32>
    %7 = arith.maximumf %5, %6 : vector<128x128xf32>
    %8 = arith.mulf %7, %7 : vector<128x128xf32>
    %c1_i32 = arith.constant 1 : i32
    %9 = tpu.dynamic_rotate %8 by %c1_i32 dim 1 : vector<128x128xf32>, i32 -> vector<128x128xf32>
    %10 = tpu.iota {dimensions = array<i32: 1>} : vector<128x128xi32>
    %c0_i32 = arith.constant 0 : i32
    %11 = vector.broadcast %c0_i32 : i32 to vector<128x128xi32>
    %12 = arith.cmpi eq, %10, %11 : vector<128x128xi32>
    %cst_6 = arith.constant 0.000000e+00 : f32
    %13 = vector.broadcast %cst_6 : f32 to vector<128x128xf32>
    %14 = arith.select %12, %13, %9 : vector<128x128xi1>, vector<128x128xf32>
    %15 = arith.addf %8, %14 : vector<128x128xf32>
    %cst_7 = arith.constant 5.000000e-01 : f32
    %16 = vector.broadcast %cst_7 : f32 to vector<128x128xf32>
    %17 = arith.mulf %16, %15 : vector<128x128xf32>
    %cst_8 = arith.constant 9.99999974E-5 : f32
    %18 = vector.broadcast %cst_8 : f32 to vector<128x128xf32>
    %19 = arith.mulf %17, %18 : vector<128x128xf32>
    %cst_9 = arith.constant 2.000000e+00 : f32
    %20 = vector.broadcast %cst_9 : f32 to vector<128x128xf32>
    %21 = arith.addf %19, %20 : vector<128x128xf32>
    %22 = math.log %21 : vector<128x128xf32>
    %cst_10 = arith.constant 7.500000e-01 : f32
    %23 = vector.broadcast %cst_10 : f32 to vector<128x128xf32>
    %24 = arith.mulf %23, %22 : vector<128x128xf32>
    %25 = math.exp %24 : vector<128x128xf32>
    %26 = arith.divf %7, %25 : vector<128x128xf32>
    %c0_11 = arith.constant 0 : index
    %c0_12 = arith.constant 0 : index
    %27 = vector.load %arg4[%c0_11, %c0_12] : memref<128x128xf32, #tpu.memory_space<vmem>>, vector<128x128xf32>
    tpu.vector_store %arg4[%c0_11, %c0_12], %26 {strides = array<i32>} : memref<128x128xf32, #tpu.memory_space<vmem>>, vector<128x128xf32>,
    return
  }
  func.func @transform_0(%arg0: i32) -> (i32, i32) {
    %c0_i32 = arith.constant 0 : i32
    %c0_i32_0 = arith.constant 0 : i32
    return %arg0, %c0_i32 : i32, i32
  }
  func.func @transform_1(%arg0: i32) -> (i32, i32) {
    %c0_i32 = arith.constant 0 : i32
    %c0_i32_0 = arith.constant 0 : i32
    %c0_i32_1 = arith.constant 0 : i32
    return %c0_i32, %c0_i32_0 : i32, i32
  }
  func.func @transform_2(%arg0: i32) -> (i32, i32) {
    %c0_i32 = arith.constant 0 : i32
    %c0_i32_0 = arith.constant 0 : i32
    %c0_i32_1 = arith.constant 0 : i32
    return %c0_i32, %c0_i32_0 : i32, i32
  }
  func.func @transform_3(%arg0: i32) -> (i32, i32) {
    %c0_i32 = arith.constant 0 : i32
    %c0_i32_0 = arith.constant 0 : i32
    return %arg0, %c0_i32 : i32, i32
  }
}

module attributes {stable_mosaic.version = 11 : i64} {
  func.func @_gemm_bias_act_kernel(%arg0: i32, %arg1: memref<32x384xbf16, #tpu.memory_space<vmem>>, %arg2: memref<384x128xbf16, #tpu.memory_space<vmem>>, %arg3: memref<1x128xf32, #tpu.memory_space<vmem>>, %arg4: memref<32x128xf32, #tpu.memory_space<vmem>>) attributes {dimension_semantics = [#tpu.dimension_semantics<parallel>], iteration_bounds = array<i64: 1>, scalar_prefetch = 0 : i64, scratch_operands = 0 : i64, tpu.core_type = #tpu.core_type<tc>, window_params = [{transform_indices = @transform_0, window_bounds = array<i64: 32, 384>}, {pipeline_mode = #tpu.pipeline_mode<synchronous>, transform_indices = @transform_1, window_bounds = array<i64: 384, 128>}, {pipeline_mode = #tpu.pipeline_mode<synchronous>, transform_indices = @transform_2, window_bounds = array<i64: 1, 128>}, {transform_indices = @transform_3, window_bounds = array<i64: 32, 128>}]} {
    %c0 = arith.constant 0 : index
    %c0_0 = arith.constant 0 : index
    %0 = vector.load %arg1[%c0, %c0_0] : memref<32x384xbf16, #tpu.memory_space<vmem>>, vector<32x384xbf16>
    %c0_1 = arith.constant 0 : index
    %c0_2 = arith.constant 0 : index
    %1 = vector.load %arg2[%c0_1, %c0_2] : memref<384x128xbf16, #tpu.memory_space<vmem>>, vector<384x128xbf16>
    %cst = arith.constant dense<0.000000e+00> : vector<32x128xf32>
    %2 = tpu.matmul %0, %1, %cst {dimension_numbers = #tpu.dot_dimension_numbers<[1], [0], [0], [1], [0, 0, 1, 1], [], []>} : vector<32x384xbf16>, vector<384x128xbf16>, vector<32x128xf32> -> vector<32x128xf32>
    %c0_3 = arith.constant 0 : index
    %c0_4 = arith.constant 0 : index
    %3 = vector.load %arg3[%c0_3, %c0_4] : memref<1x128xf32, #tpu.memory_space<vmem>>, vector<1x128xf32>
    %4 = vector.broadcast %3 : vector<1x128xf32> to vector<32x128xf32>
    %5 = arith.addf %2, %4 : vector<32x128xf32>
    %cst_5 = arith.constant 0.000000e+00 : f32
    %6 = vector.broadcast %cst_5 : f32 to vector<32x128xf32>
    %7 = arith.maximumf %5, %6 : vector<32x128xf32>
    %c0_6 = arith.constant 0 : index
    %c0_7 = arith.constant 0 : index
    %8 = vector.load %arg4[%c0_6, %c0_7] : memref<32x128xf32, #tpu.memory_space<vmem>>, vector<32x128xf32>
    tpu.vector_store %arg4[%c0_6, %c0_7], %7 {strides = array<i32>} : memref<32x128xf32, #tpu.memory_space<vmem>>, vector<32x128xf32>,
    return
  }
  func.func @transform_0(%arg0: i32) -> (i32, i32) {
    %c0_i32 = arith.constant 0 : i32
    %c0_i32_0 = arith.constant 0 : i32
    return %arg0, %c0_i32 : i32, i32
  }
  func.func @transform_1(%arg0: i32) -> (i32, i32) {
    %c0_i32 = arith.constant 0 : i32
    %c0_i32_0 = arith.constant 0 : i32
    %c0_i32_1 = arith.constant 0 : i32
    return %c0_i32, %c0_i32_0 : i32, i32
  }
  func.func @transform_2(%arg0: i32) -> (i32, i32) {
    %c0_i32 = arith.constant 0 : i32
    %c0_i32_0 = arith.constant 0 : i32
    %c0_i32_1 = arith.constant 0 : i32
    return %c0_i32, %c0_i32_0 : i32, i32
  }
  func.func @transform_3(%arg0: i32) -> (i32, i32) {
    %c0_i32 = arith.constant 0 : i32
    %c0_i32_0 = arith.constant 0 : i32
    return %arg0, %c0_i32 : i32, i32
  }
}

module attributes {stable_mosaic.version = 11 : i64} {
  func.func @_fc_tail_kernel(%arg0: memref<8x128xbf16, #tpu.memory_space<vmem>>, %arg1: memref<128x128xbf16, #tpu.memory_space<vmem>>, %arg2: memref<1x128xf32, #tpu.memory_space<vmem>>, %arg3: memref<8x128xf32, #tpu.memory_space<vmem>>, %arg4: memref<128x128xbf16, #tpu.memory_space<vmem>>, %arg5: memref<1x128xf32, #tpu.memory_space<vmem>>, %arg6: memref<8x128xf32, #tpu.memory_space<vmem>>, %arg7: memref<128x128xbf16, #tpu.memory_space<vmem>>, %arg8: memref<1x128xf32, #tpu.memory_space<vmem>>, %arg9: memref<128x128xbf16, #tpu.memory_space<vmem>>, %arg10: memref<1x128xf32, #tpu.memory_space<vmem>>, %arg11: memref<128x128xbf16, #tpu.memory_space<vmem>>, %arg12: memref<1x128xf32, #tpu.memory_space<vmem>>, %arg13: memref<8x128xf32, #tpu.memory_space<vmem>>, %arg14: memref<8x128xf32, #tpu.memory_space<vmem>>) attributes {dimension_semantics = [], scalar_prefetch = 0 : i64, scratch_operands = 0 : i64, tpu.core_type = #tpu.core_type<tc>} {
    %c0 = arith.constant 0 : index
    %c0_0 = arith.constant 0 : index
    %0 = vector.load %arg0[%c0, %c0_0] : memref<8x128xbf16, #tpu.memory_space<vmem>>, vector<8x128xbf16>
    %c0_1 = arith.constant 0 : index
    %c0_2 = arith.constant 0 : index
    %1 = vector.load %arg1[%c0_1, %c0_2] : memref<128x128xbf16, #tpu.memory_space<vmem>>, vector<128x128xbf16>
    %cst = arith.constant dense<0.000000e+00> : vector<8x128xf32>
    %2 = tpu.matmul %0, %1, %cst {dimension_numbers = #tpu.dot_dimension_numbers<[1], [0], [0], [1], [0, 0, 1, 1], [], []>} : vector<8x128xbf16>, vector<128x128xbf16>, vector<8x128xf32> -> vector<8x128xf32>
    %c0_3 = arith.constant 0 : index
    %c0_4 = arith.constant 0 : index
    %3 = vector.load %arg2[%c0_3, %c0_4] : memref<1x128xf32, #tpu.memory_space<vmem>>, vector<1x128xf32>
    %4 = vector.broadcast %3 : vector<1x128xf32> to vector<8x128xf32>
    %5 = arith.addf %2, %4 : vector<8x128xf32>
    %cst_5 = arith.constant 0.000000e+00 : f32
    %6 = vector.broadcast %cst_5 : f32 to vector<8x128xf32>
    %7 = arith.maximumf %5, %6 : vector<8x128xf32>
    %c0_6 = arith.constant 0 : index
    %c0_7 = arith.constant 0 : index
    %8 = vector.load %arg3[%c0_6, %c0_7] : memref<8x128xf32, #tpu.memory_space<vmem>>, vector<8x128xf32>
    %9 = arith.mulf %7, %8 : vector<8x128xf32>
    %10 = arith.truncf %9 : vector<8x128xf32> to vector<8x128xbf16>
    %c0_8 = arith.constant 0 : index
    %c0_9 = arith.constant 0 : index
    %11 = vector.load %arg4[%c0_8, %c0_9] : memref<128x128xbf16, #tpu.memory_space<vmem>>, vector<128x128xbf16>
    %cst_10 = arith.constant dense<0.000000e+00> : vector<8x128xf32>
    %12 = tpu.matmul %10, %11, %cst_10 {dimension_numbers = #tpu.dot_dimension_numbers<[1], [0], [0], [1], [0, 0, 1, 1], [], []>} : vector<8x128xbf16>, vector<128x128xbf16>, vector<8x128xf32> -> vector<8x128xf32>
    %c0_11 = arith.constant 0 : index
    %c0_12 = arith.constant 0 : index
    %13 = vector.load %arg5[%c0_11, %c0_12] : memref<1x128xf32, #tpu.memory_space<vmem>>, vector<1x128xf32>
    %14 = vector.broadcast %13 : vector<1x128xf32> to vector<8x128xf32>
    %15 = arith.addf %12, %14 : vector<8x128xf32>
    %cst_13 = arith.constant 0.000000e+00 : f32
    %16 = vector.broadcast %cst_13 : f32 to vector<8x128xf32>
    %17 = arith.maximumf %15, %16 : vector<8x128xf32>
    %c0_14 = arith.constant 0 : index
    %c0_15 = arith.constant 0 : index
    %18 = vector.load %arg6[%c0_14, %c0_15] : memref<8x128xf32, #tpu.memory_space<vmem>>, vector<8x128xf32>
    %19 = arith.mulf %17, %18 : vector<8x128xf32>
    %20 = arith.truncf %19 : vector<8x128xf32> to vector<8x128xbf16>
    %c0_16 = arith.constant 0 : index
    %c0_17 = arith.constant 0 : index
    %21 = vector.load %arg7[%c0_16, %c0_17] : memref<128x128xbf16, #tpu.memory_space<vmem>>, vector<128x128xbf16>
    %cst_18 = arith.constant dense<0.000000e+00> : vector<8x128xf32>
    %22 = tpu.matmul %20, %21, %cst_18 {dimension_numbers = #tpu.dot_dimension_numbers<[1], [0], [0], [1], [0, 0, 1, 1], [], []>} : vector<8x128xbf16>, vector<128x128xbf16>, vector<8x128xf32> -> vector<8x128xf32>
    %c0_19 = arith.constant 0 : index
    %c0_20 = arith.constant 0 : index
    %23 = vector.load %arg8[%c0_19, %c0_20] : memref<1x128xf32, #tpu.memory_space<vmem>>, vector<1x128xf32>
    %24 = vector.broadcast %23 : vector<1x128xf32> to vector<8x128xf32>
    %25 = arith.addf %22, %24 : vector<8x128xf32>
    %cst_21 = arith.constant 0.000000e+00 : f32
    %26 = vector.broadcast %cst_21 : f32 to vector<8x128xf32>
    %27 = arith.maximumf %25, %26 : vector<8x128xf32>
    %28 = arith.truncf %27 : vector<8x128xf32> to vector<8x128xbf16>
    %c0_22 = arith.constant 0 : index
    %c0_23 = arith.constant 0 : index
    %29 = vector.load %arg9[%c0_22, %c0_23] : memref<128x128xbf16, #tpu.memory_space<vmem>>, vector<128x128xbf16>
    %cst_24 = arith.constant dense<0.000000e+00> : vector<8x128xf32>
    %30 = tpu.matmul %28, %29, %cst_24 {dimension_numbers = #tpu.dot_dimension_numbers<[1], [0], [0], [1], [0, 0, 1, 1], [], []>} : vector<8x128xbf16>, vector<128x128xbf16>, vector<8x128xf32> -> vector<8x128xf32>
    %c0_25 = arith.constant 0 : index
    %c0_26 = arith.constant 0 : index
    %31 = vector.load %arg10[%c0_25, %c0_26] : memref<1x128xf32, #tpu.memory_space<vmem>>, vector<1x128xf32>
    %32 = vector.broadcast %31 : vector<1x128xf32> to vector<8x128xf32>
    %33 = arith.addf %30, %32 : vector<8x128xf32>
    %c0_27 = arith.constant 0 : index
    %c0_28 = arith.constant 0 : index
    %34 = vector.load %arg13[%c0_27, %c0_28] : memref<8x128xf32, #tpu.memory_space<vmem>>, vector<8x128xf32>
    tpu.vector_store %arg13[%c0_27, %c0_28], %33 {strides = array<i32>} : memref<8x128xf32, #tpu.memory_space<vmem>>, vector<8x128xf32>,
    %35 = arith.truncf %33 : vector<8x128xf32> to vector<8x128xbf16>
    %c0_29 = arith.constant 0 : index
    %c0_30 = arith.constant 0 : index
    %36 = vector.load %arg11[%c0_29, %c0_30] : memref<128x128xbf16, #tpu.memory_space<vmem>>, vector<128x128xbf16>
    %cst_31 = arith.constant dense<0.000000e+00> : vector<8x128xf32>
    %37 = tpu.matmul %35, %36, %cst_31 {dimension_numbers = #tpu.dot_dimension_numbers<[1], [0], [0], [1], [0, 0, 1, 1], [], []>} : vector<8x128xbf16>, vector<128x128xbf16>, vector<8x128xf32> -> vector<8x128xf32>
    %c0_32 = arith.constant 0 : index
    %c0_33 = arith.constant 0 : index
    %38 = vector.load %arg12[%c0_32, %c0_33] : memref<1x128xf32, #tpu.memory_space<vmem>>, vector<1x128xf32>
    %39 = vector.broadcast %38 : vector<1x128xf32> to vector<8x128xf32>
    %40 = arith.addf %37, %39 : vector<8x128xf32>
    %c0_34 = arith.constant 0 : index
    %c0_35 = arith.constant 0 : index
    %41 = vector.load %arg14[%c0_34, %c0_35] : memref<8x128xf32, #tpu.memory_space<vmem>>, vector<8x128xf32>
    tpu.vector_store %arg14[%c0_34, %c0_35], %40 {strides = array<i32>} : memref<8x128xf32, #tpu.memory_space<vmem>>, vector<8x128xf32>,
    return
  }
}

</mosaic_0001>

<bundles_post_ra>
// kernel: imagenet_forward.8
= control target key start
LH: loop header
LB: loop body
LE: loop exit
PB: predicated region body
PF: predicated region fallthrough
CT: control target
= control target key end

     0   :  { %s1516_s12 = smov 0   ;;  %s2046_s0 = inlined_call_operand.vmem [shape: bf16[512,128], index: 0, kind: input, shape index: {}]   ;;  %s2047_s1 = inlined_call_operand.vmem [shape: bf16[128,128], index: 1, kind: input, shape index: {}]   ;;  %s2048_s2 = inlined_call_operand.vmem [shape: f32[1,128], index: 2, kind: input, shape index: {}]   ;;  %s2049_s3 = inlined_call_operand.vmem [shape: f32[512,128], index: 3, kind: output, shape index: {}]  }
   0x1 LB: > { %s1138_s13 = sadd.s32 4294967295, %s1493_s12   ;;  %p1142_p0 = scmp.ge.s32.totalorder %s1493_s12, 1  ;;  %s1493_s12 = sphi %s1516_s12, %s13_s12  }
   0x2   : > { %p138_p1 = scmp.lt.s32.totalorder %s1493_s12, 3 }
   0x4   : > { %p139_p2 = pnand %p1142_p0, %p138_p1 }
   0x6   : > { %142 = sbr.rel (%p139_p2) target bundleno = 500 (0x1f4), region = 32 }
   0xb   : > { %v1271_v0 = vld [vmem:[%s2047_s1 + $0x38] sm:$0xff]   ;;  %s1143_s16 = sshll.u32 %s1138_s13, 5  ;;  %v1272_v1 = vld [vmem:[%s2047_s1 + $0x30] sm:$0xff]   ;;  %v1273_v2 = vld [vmem:[%s2047_s1 + $0x28] sm:$0xff]   ;;  %s1495_s10 = smov 1  }
   0xc   : > { %p163_p3 = scmp.lt.s32.totalorder %s1143_s16, 63  ;;  %1198 = vmatprep.subr.bf16.mxu0 %v1271_v0  ;;  %1246 = vmatprep.subr.bf16.mxu1 %v1271_v0  ;;  %v1274_v3 = vld [vmem:[%s2047_s1 + $0x20] sm:$0xff]   ;;  %v1275_v6 = vld [vmem:[%s2047_s1 + $0x18] sm:$0xff]   ;;  %v1276_v7 = vld [vmem:[%s2047_s1 + $0x10] sm:$0xff]  }
   0xd   : > { %1199 = vmatpush3.bf16.msra.mxu0 %v1271_v0  ;;  %1254 = vmatpush3.bf16.msra.mxu1 %v1271_v0  ;;  %v1277_v8 = vld [vmem:[%s2047_s1 + $0x8] sm:$0xff]   ;;  %v1278_v9 = vld [vmem:[%s2047_s1] sm:$0xff]  }
   0xe   : > { %s2099_s16 = smov (!%p163_p3, %s1143_s16), 63  ;;  %1200 = vmatprep.subr.bf16.mxu0 %v1272_v1  ;;  %1247 = vmatprep.subr.bf16.mxu1 %v1272_v1  ;;  %v1575_v24 = vld [vmem:[%s2048_s2] ss:$0 sm:$0xff] }
   0xf   : > { %s1144_s21 = sshll.u32 %s2099_s16, 2  ;;  %s1146_s11 = sshll.u32 %s2099_s16, 3 }
  0x10   : > { %s1539_s24 = scalar_lea.vmem %s2046_s0, %s1144_s21  ;;  %s1947_s15 = scalar_lea.vmem %s2049_s3, %s1146_s11 }
  0x11   : > { %1201 = vmatpush3.bf16.msra.mxu0 %v1272_v1  ;;  %1255 = vmatpush3.bf16.msra.mxu1 %v1272_v1  ;;  %v1279_v4 = vld [vmem:[%s1539_s24] sm:$0xff]   ;;  %v1281_v10 = vld [vmem:[%s1539_s24 + $0x8] sm:$0xff]   ;;  %v1283_v12 = vld [vmem:[%s1539_s24 + $0x10] sm:$0xff]  }
  0x12   : > { %1202 = vmatprep.subr.bf16.mxu0 %v1273_v2  ;;  %1248 = vmatprep.subr.bf16.mxu1 %v1273_v2  ;;  %v1280_v5 = vld [vmem:[%s1539_s24 + $0x40] sm:$0xff]   ;;  %v1282_v11 = vld [vmem:[%s1539_s24 + $0x48] sm:$0xff]   ;;  %v1285_v13 = vld [vmem:[%s1539_s24 + $0x50] sm:$0xff]  }
  0x13   : > { %1214 = vmatprep.mubr.bf16.mxu0 %v1279_v4  ;;  %1230 = vmatprep.mubr.bf16.mxu1 %v1280_v5  ;;  %v1284_v14 = vld [vmem:[%s1539_s24 + $0x18] sm:$0xff]   ;;  %v1287_v16 = vld [vmem:[%s1539_s24 + $0x20] sm:$0xff]   ;;  %v1288_v18 = vld [vmem:[%s1539_s24 + $0x28] sm:$0xff]  }
  0x14   : > { %v1286_v15 = vld [vmem:[%s1539_s24 + $0x58] sm:$0xff]   ;;  %v1289_v17 = vld [vmem:[%s1539_s24 + $0x60] sm:$0xff]   ;;  %v1290_v19 = vld [vmem:[%s1539_s24 + $0x68] sm:$0xff]  }
  0x15   : > { %1203 = vmatpush3.bf16.msra.mxu0 %v1273_v2  ;;  %1256 = vmatpush3.bf16.msra.mxu1 %v1273_v2  ;;  %v1291_v20 = vld [vmem:[%s1539_s24 + $0x30] sm:$0xff]   ;;  %v1292_v22 = vld [vmem:[%s1539_s24 + $0x38] sm:$0xff]  }
  0x16   : > { %1204 = vmatprep.subr.bf16.mxu0 %v1274_v3  ;;  %1249 = vmatprep.subr.bf16.mxu1 %v1274_v3  ;;  %v1293_v21 = vld [vmem:[%s1539_s24 + $0x70] sm:$0xff]   ;;  %v1294_v23 = vld [vmem:[%s1539_s24 + $0x78] sm:$0xff]  }
  0x19   : > { %1205 = vmatpush3.bf16.msra.mxu0 %v1274_v3  ;;  %1257 = vmatpush3.bf16.msra.mxu1 %v1274_v3 }
  0x1a   : > { %1206 = vmatprep.subr.bf16.mxu0 %v1275_v6  ;;  %1250 = vmatprep.subr.bf16.mxu1 %v1275_v6 }
  0x1d   : > { %1207 = vmatpush3.bf16.msra.mxu0 %v1275_v6  ;;  %1258 = vmatpush3.bf16.msra.mxu1 %v1275_v6 }
  0x1e   : > { %1208 = vmatprep.subr.bf16.mxu0 %v1276_v7  ;;  %1251 = vmatprep.subr.bf16.mxu1 %v1276_v7 }
  0x21   : > { %1209 = vmatpush3.bf16.msra.mxu0 %v1276_v7  ;;  %1259 = vmatpush3.bf16.msra.mxu1 %v1276_v7 }
  0x22   : > { %1210 = vmatprep.subr.bf16.mxu0 %v1277_v8  ;;  %1252 = vmatprep.subr.bf16.mxu1 %v1277_v8 }
  0x25   : > { %1211 = vmatpush3.bf16.msra.mxu0 %v1277_v8  ;;  %1260 = vmatpush3.bf16.msra.mxu1 %v1277_v8 }
  0x26   : > { %1212 = vmatprep.subr.bf16.mxu0 %v1278_v9  ;;  %1253 = vmatprep.subr.bf16.mxu1 %v1278_v9 }
  0x29   : > { %1213 = vmatpush3.bf16.msra.mxu0 %v1278_v9  ;;  %1261 = vmatpush3.bf16.msra.mxu1 %v1278_v9 }
  0x2c   : > { %1215 = vmatmul.mubr.bf16.vlgmr.msra.gmra.mxu0 %v1281_v10  ;;  %1231 = vmatmul.mubr.bf16.vlgmr.msra.gmra.mxu1 %v1282_v11 }
  0x2d   : > { %1218 = vmatprep.mubr.bf16.mxu0 %v1283_v12  ;;  %1234 = vmatprep.mubr.bf16.mxu1 %v1285_v13 }
  0x34   : > { %1219 = vmatmul.mubr.bf16.gmra.mxu0 %v1284_v14  ;;  %1235 = vmatmul.mubr.bf16.gmra.mxu1 %v1286_v15 }
  0x35   : > { %1222 = vmatprep.mubr.bf16.mxu0 %v1287_v16  ;;  %1238 = vmatprep.mubr.bf16.mxu1 %v1289_v17 }
  0x3c   : > { %1223 = vmatmul.mubr.bf16.gmra.mxu0 %v1288_v18  ;;  %1239 = vmatmul.mubr.bf16.gmra.mxu1 %v1290_v19 }
  0x3d   : > { %1226 = vmatprep.mubr.bf16.mxu0 %v1291_v20  ;;  %1242 = vmatprep.mubr.bf16.mxu1 %v1293_v21 }
  0x44   : > { %1227 = vmatmul.mubr.bf16.gmra.mxu0 %v1292_v22  ;;  %1243 = vmatmul.mubr.bf16.gmra.mxu1 %v1294_v23 }
  0xec   : > { %v1216_v25 = vpop.f32.mrf.mxu0  ;;  %v1232_v26 = vpop.f32.mrf.mxu1 }
  0xed   : > { %v417_v27 = vadd.f32 %v1216_v25, %v1575_v24  ;;  %v481_v28 = vadd.f32 %v1232_v26, %v1575_v24 }
  0xee   : > { %v408_v29 = vpop.f32.mrf.mxu0  ;;  %v472_v30 = vpop.f32.mrf.mxu1 }
  0xef   : > { %v1579_v31 = vmax.f32 %v417_v27, 0.0  ;;  %v1581_v32 = vmax.f32 %v481_v28, 0.0  ;;  %v409_v33 = vadd.f32 %v1575_v24, %v408_v29  ;;  %v473_v36 = vadd.f32 %v1575_v24, %v472_v30 }
  0xf0   : > { %v1217_v34 = vpop.f32.mrf.mxu0  ;;  %v1233_v35 = vpop.f32.mrf.mxu1 }
  0xf1   : > { %v420_v37 = vadd.f32 %v1217_v34, %v1575_v24  ;;  %v1586_v38 = vmax.f32 %v409_v33, 0.0  ;;  %v484_v39 = vadd.f32 %v1233_v35, %v1575_v24  ;;  %v1591_v41 = vmul.f32 %v1581_v32, %v1581_v32 }
  0xf2   : > { %v411_v40 = vpop.f32.mrf.mxu0  ;;  %v1595_v42 = vmul.f32 %v1579_v31, %v1579_v31  ;;  %v475_v44 = vpop.f32.mrf.mxu1  ;;  %v1603_v46 = vmax.f32 %v473_v36, 0.0 }
  0xf3   : > { %v1597_v43 = vmax.f32 %v420_v37, 0.0  ;;  %635 = vrot.lane.b32.xlu0 %v1591_v41, %s1495_s10  ;;  %v1611_v49 = vmul.f32 %v1586_v38, %v1586_v38  ;;  %v1613_v50 = vmax.f32 %v484_v39, 0.0  ;;  %v412_v51 = vadd.f32 %v1575_v24, %v411_v40 }
  0xf4   : > { %603 = vrot.lane.b32.xlu1 %v1595_v42, %s1495_s10  ;;  %v1220_v45 = vpop.f32.mrf.mxu0  ;;  %v1236_v48 = vpop.f32.mrf.mxu1  ;;  %v476_v52 = vadd.f32 %v1575_v24, %v475_v44  ;;  %v1623_v55 = vmul.f32 %v1603_v46, %v1603_v46 }
  0xf5   : > { %v1607_v47 = vmul.f32 %v1597_v43, %v1597_v43  ;;  %v433_v56 = vadd.f32 %v1220_v45, %v1575_v24  ;;  %v1628_v58 = vmul.f32 %v1613_v50, %v1613_v50  ;;  %v1630_v59 = vmax.f32 %v412_v51, 0.0 }
  0xf6   : > { %v424_v53 = vpop.f32.mrf.mxu0  ;;  %v488_v57 = vpop.f32.mrf.mxu1  ;;  %v1632_v60 = vmax.f32 %v476_v52, 0.0  ;;  %v497_v63 = vadd.f32 %v1236_v48, %v1575_v24 }
  0xf7   : > { %599 = vrot.lane.b32.xlu0 %v1611_v49, %s1495_s10  ;;  %v1639_v62 = vmax.f32 %v433_v56, 0.0  ;;  %v1644_v1 = vmul.f32 %v1630_v59, %v1630_v59  ;;  %v425_v6 = vadd.f32 %v1575_v24, %v424_v53  ;;  %v489_v15 = vadd.f32 %v1575_v24, %v488_v57 }
  0xf8   : > { %605 = vrot.lane.b32.xlu1 %v1607_v47, %s1495_s10  ;;  %v1221_v54 = vpop.f32.mrf.mxu0  ;;  %v1237_v0 = vpop.f32.mrf.mxu1  ;;  %v1648_v2 = vmul.f32 %v1632_v60, %v1632_v60  ;;  %v1658_v7 = vmax.f32 %v497_v63, 0.0 }
  0xf9   : > { %v436_v61 = vadd.f32 %v1221_v54, %v1575_v24  ;;  %v500_v4 = vadd.f32 %v1237_v0, %v1575_v24  ;;  %v1662_v9 = vmul.f32 %v1639_v62, %v1639_v62  ;;  %v1675_v14 = vmax.f32 %v425_v6, 0.0 }
  0xfa   : > { %v427_v5 = vpop.f32.mrf.mxu0  ;;  %v491_v13 = vpop.f32.mrf.mxu1  ;;  %v1680_v18 = vmul.f32 %v1658_v7, %v1658_v7  ;;  %v1697_v23 = vmax.f32 %v489_v15, 0.0 }
  0xfb   : > { %631 = vrot.lane.b32.xlu0 %v1623_v55, %s1495_s10  ;;  %v1650_v3 = vmax.f32 %v436_v61, 0.0  ;;  %v428_v11 = vadd.f32 %v1575_v24, %v427_v5  ;;  %v1669_v12 = vmax.f32 %v500_v4, 0.0  ;;  %v492_v21 = vadd.f32 %v1575_v24, %v491_v13 }
  0xfc   : > { %637 = vrot.lane.b32.xlu1 %v1628_v58, %s1495_s10  ;;  %v1224_v8 = vpop.f32.mrf.mxu0  ;;  %v1240_v17 = vpop.f32.mrf.mxu1  ;;  %v1695_v22 = vmul.f32 %v1675_v14, %v1675_v14  ;;  %v1713_v33 = vmul.f32 %v1697_v23, %v1697_v23 }
  0xfd   : > { %v1666_v10 = vmul.f32 %v1650_v3, %v1650_v3  ;;  %v1682_v19 = vmax.f32 %v428_v11, 0.0  ;;  %v1686_v20 = vmul.f32 %v1669_v12, %v1669_v12  ;;  %v1703_v28 = vmax.f32 %v492_v21, 0.0 }
  0xfe   : > { %v440_v16 = vpop.f32.mrf.mxu0  ;;  %v504_v26 = vpop.f32.mrf.mxu1  ;;  %v449_v29 = vadd.f32 %v1224_v8, %v1575_v24  ;;  %v513_v34 = vadd.f32 %v1240_v17, %v1575_v24 }
  0xff   : > { %601 = vrot.lane.b32.xlu0 %v1644_v1, %s1495_s10  ;;  %v1701_v27 = vmul.f32 %v1682_v19, %v1682_v19  ;;  %v1718_v37 = vmul.f32 %v1703_v28, %v1703_v28  ;;  %v441_v48 = vadd.f32 %v1575_v24, %v440_v16  ;;  %v505_v4 = vadd.f32 %v1575_v24, %v504_v26 }
 0x100   : > { %633 = vrot.lane.b32.xlu1 %v1648_v2, %s1495_s10  ;;  %v1225_v25 = vpop.f32.mrf.mxu0  ;;  %v1241_v36 = vpop.f32.mrf.mxu1  ;;  %v1720_v39 = vmax.f32 %v449_v29, 0.0  ;;  %v1730_v51 = vmax.f32 %v513_v34, 0.0 }
 0x101   : > { %v452_v30 = vadd.f32 %v1225_v25, %v1575_v24  ;;  %v516_v44 = vadd.f32 %v1241_v36, %v1575_v24  ;;  %v1747_v0 = vmax.f32 %v441_v48, 0.0  ;;  %v1765_v16 = vmax.f32 %v505_v4, 0.0 }
 0x102   : > { %v443_v35 = vpop.f32.mrf.mxu0  ;;  %2066 = vst [vmem:[#allocation2_spill] sm:$0xff] %v1720_v39  ;;  %2068 = vst [vmem:[#allocation4_spill] sm:$0xff] %v1730_v51  ;;  %v507_v52 = vpop.f32.mrf.mxu1  ;;  %v1734_v53 = vmul.f32 %v1720_v39, %v1720_v39  ;;  %v1752_v5 = vmul.f32 %v1730_v51, %v1730_v51 }
 0x103   : > { %611 = vrot.lane.b32.xlu0 %v1662_v9, %s1495_s10  ;;  %v1722_v40 = vmax.f32 %v452_v30, 0.0  ;;  %v444_v56 = vadd.f32 %v1575_v24, %v443_v35  ;;  %v1741_v57 = vmax.f32 %v516_v44, 0.0  ;;  %2070 = vst [vmem:[#allocation6_spill] sm:$0xff] %v1747_v0  ;;  %v508_v11 = vadd.f32 %v1575_v24, %v507_v52  ;;  %2072 = vst [vmem:[#allocation8_spill] sm:$0xff] %v1765_v16 }
 0x104   : > { %613 = vrot.lane.b32.xlu1 %v1666_v10, %s1495_s10  ;;  %v1228_v45 = vpop.f32.mrf.mxu0  ;;  %v1244_v63 = vpop.f32.mrf.mxu1  ;;  %v1770_v21 = vmul.f32 %v1747_v0, %v1747_v0  ;;  %v1785_v35 = vmul.f32 %v1765_v16, %v1765_v16 }
 0x105   : > { %2067 = vst [vmem:[#allocation3_spill] sm:$0xff] %v1722_v40  ;;  %v1738_v54 = vmul.f32 %v1722_v40, %v1722_v40  ;;  %2069 = vst [vmem:[#allocation5_spill] sm:$0xff] %v1741_v57  ;;  %v1754_v6 = vmax.f32 %v444_v56, 0.0  ;;  %v1758_v8 = vmul.f32 %v1741_v57, %v1741_v57  ;;  %v465_v17 = vadd.f32 %v1228_v45, %v1575_v24 }
 0x106   : > { %v456_v61 = vpop.f32.mrf.mxu0  ;;  %v520_v15 = vpop.f32.mrf.mxu1  ;;  %v1776_v26 = vmax.f32 %v508_v11, 0.0 }
 0x107   : > { %643 = vrot.lane.b32.xlu0 %v1680_v18, %s1495_s10  ;;  %2071 = vst [vmem:[#allocation7_spill] sm:$0xff] %v1754_v6  ;;  %v1774_v25 = vmul.f32 %v1754_v6, %v1754_v6  ;;  %v1787_v36 = vmax.f32 %v465_v17, 0.0  ;;  %v457_v45 = vadd.f32 %v1575_v24, %v456_v61  ;;  %v521_v11 = vadd.f32 %v1575_v24, %v520_v15 }
 0x108   : > { %645 = vrot.lane.b32.xlu1 %v1686_v20, %s1495_s10  ;;  %v1229_v13 = vpop.f32.mrf.mxu0  ;;  %2073 = vst [vmem:[#allocation9_spill] sm:$0xff] %v1776_v26  ;;  %v1245_v34 = vpop.f32.mrf.mxu1  ;;  %v1791_v44 = vmul.f32 %v1776_v26, %v1776_v26 }
 0x109   : > { %v468_v29 = vadd.f32 %v1229_v13, %v1575_v24  ;;  %2074 = vst [vmem:[#allocation10_spill] sm:$0xff] %v1787_v36  ;;  %v1803_v4 = vmul.f32 %v1787_v36, %v1787_v36  ;;  %v1806_v13 = vmax.f32 %v457_v45, 0.0  ;;  %v1820_v36 = vmax.f32 %v521_v11, 0.0 }
 0x10a   : > { %v459_v30 = vpop.f32.mrf.mxu0  ;;  %v523_v56 = vpop.f32.mrf.mxu1 }
 0x10b   : > { %607 = vrot.lane.b32.xlu0 %v1695_v22, %s1495_s10  ;;  %v1794_v48 = vmax.f32 %v468_v29, 0.0  ;;  %v460_v52 = vadd.f32 %v1575_v24, %v459_v30  ;;  %2076 = vst [vmem:[#allocation12_spill] sm:$0xff] %v1806_v13  ;;  %v524_v29 = vadd.f32 %v1575_v24, %v523_v56  ;;  %v529_v30 = vadd.f32 %v1244_v63, %v1575_v24 }
 0x10c   : > { %609 = vrot.lane.b32.xlu1 %v1701_v27, %s1495_s10  ;;  %2078 = vst [vmem:[#allocation14_spill] sm:$0xff] %v1820_v36  ;;  %v1824_v15 = vmul.f32 %v1806_v13, %v1806_v13  ;;  %v1841_v11 = vmul.f32 %v1820_v36, %v1820_v36 }
 0x10d   : > { %2075 = vst [vmem:[#allocation11_spill] sm:$0xff] %v1794_v48  ;;  %v1810_v61 = vmul.f32 %v1794_v48, %v1794_v48  ;;  %v1812_v17 = vmax.f32 %v460_v52, 0.0  ;;  %v532_v52 = vadd.f32 %v1245_v34, %v1575_v24  ;;  %v1831_v56 = vmax.f32 %v524_v29, 0.0 }
 0x10e   : > { %v1837_v63 = vmax.f32 %v529_v30, 0.0  ;;  %v663_v29 = vlaneseq }
 0x10f   : > { %639 = vrot.lane.b32.xlu0 %v1713_v33, %s1495_s10  ;;  %2077 = vst [vmem:[#allocation13_spill] sm:$0xff] %v1812_v17  ;;  %v1828_v45 = vmul.f32 %v1812_v17, %v1812_v17  ;;  %2079 = vst [vmem:[#allocation15_spill] sm:$0xff] %v1831_v56  ;;  %v1843_v13 = vmax.f32 %v532_v52, 0.0  ;;  %v1847_v17 = vmul.f32 %v1831_v56, %v1831_v56 }
 0x110   : > { %641 = vrot.lane.b32.xlu1 %v1718_v37, %s1495_s10  ;;  %2080 = vst [vmem:[#allocation16_spill] sm:$0xff] %v1837_v63  ;;  %v1855_v24 = vmul.f32 %v1837_v63, %v1837_v63  ;;  %v1865_v30 = vand.u32 127, %v663_v29 }
 0x111   : > { %2081 = vst [vmem:[#allocation17_spill] sm:$0xff] %v1843_v13  ;;  %v1859_v34 = vmul.f32 %v1843_v13, %v1843_v13 }
 0x112   : > { %vm665_vm0 = vcmp.eq.s32.totalorder %v1865_v30, 0 }
 0x113   : > { %619 = vrot.lane.b32.xlu0 %v1734_v53, %s1495_s10 }
 0x114   : > { %621 = vrot.lane.b32.xlu1 %v1738_v54, %s1495_s10 }
 0x117   : > { %651 = vrot.lane.b32.xlu0 %v1752_v5, %s1495_s10 }
 0x118   : > { %653 = vrot.lane.b32.xlu1 %v1758_v8, %s1495_s10 }
 0x11b   : > { %615 = vrot.lane.b32.xlu0 %v1770_v21, %s1495_s10 }
 0x11c   : > { %617 = vrot.lane.b32.xlu1 %v1774_v25, %s1495_s10 }
 0x11f   : > { %647 = vrot.lane.b32.xlu0 %v1785_v35, %s1495_s10 }
 0x120   : > { %649 = vrot.lane.b32.xlu1 %v1791_v44, %s1495_s10 }
 0x123   : > { %627 = vrot.lane.b32.xlu0 %v1803_v4, %s1495_s10 }
 0x124   : > { %629 = vrot.lane.b32.xlu1 %v1810_v61, %s1495_s10 }
 0x127   : > { %623 = vrot.lane.b32.xlu0 %v1824_v15, %s1495_s10 }
 0x128   : > { %625 = vrot.lane.b32.xlu1 %v1828_v45, %s1495_s10 }
 0x12b   : > { %655 = vrot.lane.b32.xlu0 %v1841_v11, %s1495_s10 }
 0x12c   : > { %657 = vrot.lane.b32.xlu1 %v1847_v17, %s1495_s10 }
 0x12f   : > { %659 = vrot.lane.b32.xlu0 %v1855_v24, %s1495_s10 }
 0x130   : > { %661 = vrot.lane.b32.xlu1 %v1859_v34, %s1495_s10 }
 0x165   : > { %v636_v52 = vpop.permute.xlu0 %635 }
 0x166   : > { %v604_v36 = vpop.permute.xlu1 %603  ;;  %v684_v63 = vsel %vm665_vm0, 0.0, %v636_v52 }
 0x167   : > { %v668_v13 = vsel %vm665_vm0, 0.0, %v604_v36  ;;  %v716_v56 = vadd.f32 %v684_v63, %v1591_v41 }
 0x168   : > { %v700_v48 = vadd.f32 %v668_v13, %v1595_v42 }
 0x169   : > { %v748_v16 = vmul.f32 0.5, %v716_v56  ;;  %v600_v6 = vpop.permute.xlu0 %599 }
 0x16a   : > { %v732_v26 = vmul.f32 0.5, %v700_v48  ;;  %v606_v0 = vpop.permute.xlu1 %605  ;;  %v666_v51 = vsel %vm665_vm0, 0.0, %v600_v6 }
 0x16b   : > { %v669_v29 = vsel %vm665_vm0, 0.0, %v606_v0  ;;  %v780_v57 = vmul.f32 0.0001, %v748_v16  ;;  %v698_v36 = vadd.f32 %v666_v51, %v1611_v49 }
 0x16c   : > { %v764_v39 = vmul.f32 0.0001, %v732_v26  ;;  %v701_v52 = vadd.f32 %v669_v29, %v1607_v47 }
 0x16d   : > { %v812_v40 = vadd.f32 2.0, %v780_v57  ;;  %v730_v42 = vmul.f32 0.5, %v698_v36  ;;  %v632_v48 = vpop.permute.xlu0 %631 }
 0x16e   : > { %v796_v41 = vadd.f32 2.0, %v764_v39  ;;  %v733_v63 = vmul.f32 0.5, %v701_v52  ;;  %v638_v13 = vpop.permute.xlu1 %637  ;;  %v682_v0 = vsel %vm665_vm0, 0.0, %v632_v48 }
 0x16f   : > { %v685_v56 = vsel %vm665_vm0, 0.0, %v638_v13  ;;  %1295 = vlog2.f32 %v812_v40  ;;  %v762_v16 = vmul.f32 0.0001, %v730_v42  ;;  %v714_v47 = vadd.f32 %v682_v0, %v1623_v55 }
 0x170   : > { %v765_v6 = vmul.f32 0.0001, %v733_v63  ;;  %v717_v26 = vadd.f32 %v685_v56, %v1628_v58  ;;  %1297 = vlog2.f32 %v796_v41 }
 0x171   : > { %v794_v39 = vadd.f32 2.0, %v762_v16  ;;  %v602_v29 = vpop.permute.xlu0 %601  ;;  %v746_v52 = vmul.f32 0.5, %v714_v47 }
 0x172   : > { %v797_v49 = vadd.f32 2.0, %v765_v6  ;;  %v749_v51 = vmul.f32 0.5, %v717_v26  ;;  %v634_v57 = vpop.permute.xlu1 %633  ;;  %v667_v13 = vsel %vm665_vm0, 0.0, %v602_v29 }
 0x173   : > { %v683_v36 = vsel %vm665_vm0, 0.0, %v634_v57  ;;  %v699_v58 = vadd.f32 %v667_v13, %v1644_v1  ;;  %v778_v55 = vmul.f32 0.0001, %v746_v52 }
 0x174   : > { %1299 = vlog2.f32 %v797_v49  ;;  %v781_v40 = vmul.f32 0.0001, %v749_v51  ;;  %v715_v63 = vadd.f32 %v683_v36, %v1648_v2 }
 0x175   : > { %1301 = vlog2.f32 %v794_v39  ;;  %v731_v48 = vmul.f32 0.5, %v699_v58  ;;  %v612_v0 = vpop.permute.xlu0 %611  ;;  %v810_v6 = vadd.f32 2.0, %v778_v55 }
 0x176   : > { %v813_v41 = vadd.f32 2.0, %v781_v40  ;;  %v747_v42 = vmul.f32 0.5, %v715_v63  ;;  %v614_v56 = vpop.permute.xlu1 %613  ;;  %v672_v26 = vsel %vm665_vm0, 0.0, %v612_v0 }
 0x177   : > { %v673_v16 = vsel %vm665_vm0, 0.0, %v614_v56  ;;  %v763_v49 = vmul.f32 0.0001, %v731_v48  ;;  %v704_v1 = vadd.f32 %v672_v26, %v1662_v9 }
 0x178   : > { %1303 = vlog2.f32 %v813_v41  ;;  %v779_v47 = vmul.f32 0.0001, %v747_v42  ;;  %v705_v2 = vadd.f32 %v673_v16, %v1666_v10 }
 0x179   : > { %1305 = vlog2.f32 %v810_v6  ;;  %v795_v51 = vadd.f32 2.0, %v763_v49  ;;  %v644_v52 = vpop.permute.xlu0 %643  ;;  %v736_v36 = vmul.f32 0.5, %v704_v1 }
 0x17a   : > { %v811_v39 = vadd.f32 2.0, %v779_v47  ;;  %v737_v57 = vmul.f32 0.5, %v705_v2  ;;  %v646_v29 = vpop.permute.xlu1 %645  ;;  %v688_v40 = vsel %vm665_vm0, 0.0, %v644_v52 }
 0x17b   : > { %v689_v13 = vsel %vm665_vm0, 0.0, %v646_v29  ;;  %v720_v10 = vadd.f32 %v688_v40, %v1680_v18  ;;  %v768_v9 = vmul.f32 0.0001, %v736_v36 }
 0x17c   : > { %1307 = vlog2.f32 %v811_v39  ;;  %v769_v63 = vmul.f32 0.0001, %v737_v57  ;;  %v721_v58 = vadd.f32 %v689_v13, %v1686_v20  ;;  %v1296_v55 = vpop.eup %1295 }
 0x17d   : > { %1309 = vlog2.f32 %v795_v51  ;;  %v1298_v41 = vpop.eup %1297  ;;  %v863_v42 = vmul.f32 0.6931472, %v1296_v55  ;;  %v752_v0 = vmul.f32 0.5, %v720_v10  ;;  %v608_v16 = vpop.permute.xlu0 %607  ;;  %v800_v47 = vadd.f32 2.0, %v768_v9 }
 0x17e   : > { %v801_v48 = vadd.f32 2.0, %v769_v63  ;;  %v753_v56 = vmul.f32 0.5, %v721_v58  ;;  %v610_v6 = vpop.permute.xlu1 %609  ;;  %v831_v26 = vmul.f32 0.6931472, %v1298_v41  ;;  %v670_v20 = vsel %vm665_vm0, 0.0, %v608_v16 }
 0x17f   : > { %v671_v49 = vsel %vm665_vm0, 0.0, %v610_v6  ;;  %v908_v2 = vmul.f32 0.75, %v863_v42  ;;  %v784_v1 = vmul.f32 0.0001, %v752_v0  ;;  %v702_v29 = vadd.f32 %v670_v20, %v1695_v22 }
 0x180   : > { %1311 = vlog2.f32 %v801_v48  ;;  %v785_v18 = vmul.f32 0.0001, %v753_v56  ;;  %v892_v51 = vmul.f32 0.75, %v831_v26  ;;  %v703_v57 = vadd.f32 %v671_v49, %v1701_v27 }
 0x181   : > { %v1300_v39 = vpop.eup %1299  ;;  %1313 = vlog2.f32 %v800_v47  ;;  %v958_v36 = vmul.f32 1.442695, %v908_v2  ;;  %v816_v63 = vadd.f32 2.0, %v784_v1  ;;  %v640_v10 = vpop.permute.xlu0 %639  ;;  %v734_v42 = vmul.f32 0.5, %v702_v29 }
 0x182   : > { %v1302_v52 = vpop.eup %1301  ;;  %v833_v13 = vmul.f32 0.6931472, %v1300_v39  ;;  %v817_v40 = vadd.f32 2.0, %v785_v18  ;;  %v642_v58 = vpop.permute.xlu1 %641  ;;  %v926_v55 = vmul.f32 1.442695, %v892_v51  ;;  %v735_v41 = vmul.f32 0.5, %v703_v57 }
 0x183   : > { %v827_v9 = vmul.f32 0.6931472, %v1302_v52  ;;  %1315 = vpow2.f32 %v958_v36  ;;  %v687_v56 = vsel %vm665_vm0, 0.0, %v642_v58  ;;  %v686_v27 = vsel %vm665_vm0, 0.0, %v640_v10 }
 0x184   : > { %v893_v48 = vmul.f32 0.75, %v833_v13  ;;  %1317 = vpow2.f32 %v926_v55  ;;  %v767_v6 = vmul.f32 0.0001, %v735_v41  ;;  %v766_v16 = vmul.f32 0.0001, %v734_v42 }
 0x185   : > { %v1304_v22 = vpop.eup %1303  ;;  %v890_v0 = vmul.f32 0.75, %v827_v9  ;;  %1319 = vlog2.f32 %v817_v40  ;;  %v719_v20 = vadd.f32 %v687_v56, %v1718_v37  ;;  %v620_v18 = vpop.permute.xlu0 %619  ;;  %v718_v58 = vadd.f32 %v686_v27, %v1713_v33 }
 0x186   : > { %v1306_v26 = vpop.eup %1305  ;;  %v928_v47 = vmul.f32 1.442695, %v893_v48  ;;  %v865_v49 = vmul.f32 0.6931472, %v1304_v22  ;;  %v622_v2 = vpop.permute.xlu1 %621  ;;  %1321 = vlog2.f32 %v816_v63  ;;  %v799_v51 = vadd.f32 2.0, %v767_v6 }
 0x187   : > { %v922_v1 = vmul.f32 1.442695, %v890_v0  ;;  %v859_v39 = vmul.f32 0.6931472, %v1306_v26  ;;  %v798_v29 = vadd.f32 2.0, %v766_v16  ;;  %v751_v52 = vmul.f32 0.5, %v719_v20 }
 0x188   : > { %1323 = vpow2.f32 %v928_v47  ;;  %v909_v57 = vmul.f32 0.75, %v865_v49  ;;  %v677_v40 = vsel %vm665_vm0, 0.0, %v622_v2  ;;  %v750_v56 = vmul.f32 0.5, %v718_v58 }
 0x189   : > { %v1308_v36 = vpop.eup %1307  ;;  %1325 = vpow2.f32 %v922_v1  ;;  %v906_v13 = vmul.f32 0.75, %v859_v39  ;;  %v783_v9 = vmul.f32 0.0001, %v751_v52  ;;  %v652_v63 = vpop.permute.xlu0 %651  ;;  %v709_v6 = vadd.f32 %v677_v40, %v1738_v54 }
 0x18a   : > { %v1310_v10 = vpop.eup %1309  ;;  %v960_v37 = vmul.f32 1.442695, %v909_v57  ;;  %v861_v55 = vmul.f32 0.6931472, %v1308_v36  ;;  %1327 = vlog2.f32 %v799_v51  ;;  %v654_v41 = vpop.permute.xlu1 %653  ;;  %v782_v16 = vmul.f32 0.0001, %v750_v56 }
 0x18b   : > { %v954_v42 = vmul.f32 1.442695, %v906_v13  ;;  %v829_v48 = vmul.f32 0.6931472, %v1310_v10  ;;  %1329 = vlog2.f32 %v798_v29  ;;  %v815_v0 = vadd.f32 2.0, %v783_v9 }
 0x18c   : > { %1331 = vpow2.f32 %v960_v37  ;;  %v907_v22 = vmul.f32 0.75, %v861_v55  ;;  %v676_v26 = vsel %vm665_vm0, 0.0, %v620_v18  ;;  %v741_v2 = vmul.f32 0.5, %v709_v6 }
 0x18d   : > { %v1312_v33 = vpop.eup %1311  ;;  %1333 = vpow2.f32 %v954_v42  ;;  %v891_v27 = vmul.f32 0.75, %v829_v48  ;;  %v616_v39 = vpop.permute.xlu0 %615  ;;  %v708_v29 = vadd.f32 %v676_v26, %v1734_v53  ;;  %v693_v36 = vsel %vm665_vm0, 0.0, %v654_v41 }
 0x18e   : > { %v1314_v47 = vpop.eup %1313  ;;  %v956_v49 = vmul.f32 1.442695, %v907_v22  ;;  %v841_v20 = vmul.f32 0.6931472, %v1312_v33  ;;  %1335 = vlog2.f32 %v815_v0  ;;  %v618_v1 = vpop.permute.xlu1 %617  ;;  %v773_v52 = vmul.f32 0.0001, %v741_v2 }
 0x18f   : > { %v924_v51 = vmul.f32 1.442695, %v891_v27  ;;  %v839_v57 = vmul.f32 0.6931472, %v1314_v47  ;;  %v740_v58 = vmul.f32 0.5, %v708_v29  ;;  %v725_v40 = vadd.f32 %v693_v36, %v1758_v8 }
 0x190   : > { %1337 = vpow2.f32 %v956_v49  ;;  %v897_v54 = vmul.f32 0.75, %v841_v20  ;;  %v1316_v13 = vpop.eup %1315  ;;  %v814_v55 = vadd.f32 2.0, %v782_v16  ;;  %v692_v9 = vsel %vm665_vm0, 0.0, %v652_v63 }
 0x191   : > { %1339 = vpow2.f32 %v924_v51  ;;  %v896_v18 = vmul.f32 0.75, %v839_v57  ;;  %v1318_v10 = vpop.eup %1317  ;;  %v772_v48 = vmul.f32 0.0001, %v740_v58  ;;  %v757_v56 = vmul.f32 0.5, %v725_v40  ;;  %v648_v41 = vpop.permute.xlu0 %647 }
 0x192   : > { %1341 = vrcp.f32 %v1316_v13  ;;  %v936_v37 = vmul.f32 1.442695, %v897_v54  ;;  %v1320_v53 = vpop.eup %1319  ;;  %v650_v22 = vpop.permute.xlu1 %649  ;;  %v724_v33 = vadd.f32 %v692_v9, %v1752_v5  ;;  %v675_v8 = vsel %vm665_vm0, 0.0, %v618_v1 }
 0x193   : > { %1343 = vrcp.f32 %v1318_v10  ;;  %v934_v42 = vmul.f32 1.442695, %v896_v18  ;;  %v1322_v0 = vpop.eup %1321  ;;  %v873_v6 = vmul.f32 0.6931472, %v1320_v53  ;;  %v805_v26 = vadd.f32 2.0, %v773_v52 }
 0x194   : > { %1345 = vpow2.f32 %v936_v37  ;;  %v871_v16 = vmul.f32 0.6931472, %v1322_v0  ;;  %v789_v63 = vmul.f32 0.0001, %v757_v56  ;;  %v756_v20 = vmul.f32 0.5, %v724_v33 }
 0x195   : > { %v1324_v27 = vpop.eup %1323  ;;  %1347 = vpow2.f32 %v934_v42  ;;  %v913_v49 = vmul.f32 0.75, %v873_v6  ;;  %v707_v2 = vadd.f32 %v675_v8, %v1774_v25  ;;  %v1931_v29 = vadd.f32 2.0, %v772_v48  ;;  %v628_v10 = vpop.permute.xlu0 %627 }
 0x196   : > { %v1326_v47 = vpop.eup %1325  ;;  %1349 = vrcp.f32 %v1324_v27  ;;  %v912_v57 = vmul.f32 0.75, %v871_v16  ;;  %v674_v5 = vsel %vm665_vm0, 0.0, %v616_v39  ;;  %v788_v52 = vmul.f32 0.0001, %v756_v20  ;;  %v630_v25 = vpop.permute.xlu1 %629 }
 0x197   : > { %v1328_v51 = vpop.eup %1327  ;;  %1351 = vrcp.f32 %v1326_v47  ;;  %v968_v54 = vmul.f32 1.442695, %v913_v49  ;;  %v739_v40 = vmul.f32 0.5, %v707_v2  ;;  %v1935_v53 = vadd.f32 2.0, %v789_v63 }
 0x198   : > { %v1330_v1 = vpop.eup %1329  ;;  %v837_v36 = vmul.f32 0.6931472, %v1328_v51  ;;  %1353 = vlog2.f32 %v814_v55  ;;  %v966_v18 = vmul.f32 1.442695, %v912_v57  ;;  %v706_v39 = vadd.f32 %v674_v5, %v1770_v21 }
 0x199   : > { %v1332_v13 = vpop.eup %1331  ;;  %v835_v58 = vmul.f32 0.6931472, %v1330_v1  ;;  %1355 = vlog2.f32 %v805_v26  ;;  %v771_v55 = vmul.f32 0.0001, %v739_v40  ;;  %v691_v56 = vsel %vm665_vm0, 0.0, %v650_v22  ;;  %v624_v57 = vpop.permute.xlu0 %623 }
 0x19a   : > { %v1334_v37 = vpop.eup %1333  ;;  %1357 = vrcp.f32 %v1332_v13  ;;  %v895_v9 = vmul.f32 0.75, %v837_v36  ;;  %v738_v33 = vmul.f32 0.5, %v706_v39  ;;  %v820_v16 = vadd.f32 2.0, %v788_v52  ;;  %v626_v51 = vpop.permute.xlu1 %625 }
 0x19b   : > { %v1336_v42 = vpop.eup %1335  ;;  %1359 = vrcp.f32 %v1334_v37  ;;  %v894_v48 = vmul.f32 0.75, %v835_v58  ;;  %v723_v26 = vadd.f32 %v691_v56, %v1791_v44  ;;  %v690_v49 = vsel %vm665_vm0, 0.0, %v648_v41 }
 0x19c   : > { %1361 = vpow2.f32 %v968_v54  ;;  %v932_v0 = vmul.f32 1.442695, %v895_v9  ;;  %v869_v6 = vmul.f32 0.6931472, %v1336_v42  ;;  %v770_v47 = vmul.f32 0.0001, %v738_v33 }
 0x19d   : > { %v1338_v8 = vpop.eup %1337  ;;  %1363 = vpow2.f32 %v966_v18  ;;  %v930_v27 = vmul.f32 1.442695, %v894_v48  ;;  %v755_v22 = vmul.f32 0.5, %v723_v26  ;;  %v722_v2 = vadd.f32 %v690_v49, %v1785_v35  ;;  %v656_v33 = vpop.permute.xlu0 %655 }
 0x19e   : > { %v1340_v63 = vpop.eup %1339  ;;  %1365 = vrcp.f32 %v1338_v8  ;;  %v911_v21 = vmul.f32 0.75, %v869_v6  ;;  %v681_v44 = vsel %vm665_vm0, 0.0, %v630_v25  ;;  %v803_v54 = vadd.f32 2.0, %v771_v55  ;;  %v658_v6 = vpop.permute.xlu1 %657 }
 0x19f   : > { %v1342_v20 = vpop.eup %1341  ;;  %1367 = vrcp.f32 %v1340_v63  ;;  %v787_v13 = vmul.f32 0.0001, %v755_v22  ;;  %v754_v18 = vmul.f32 0.5, %v722_v2  ;;  %v713_v35 = vadd.f32 %v681_v44, %v1810_v61 }
 0x1a0   : > { %v1344_v5 = vpop.eup %1343  ;;  %v1023_v1 = vmul.f32 %v1342_v20, %v1581_v32  ;;  %1369 = vpow2.f32 %v932_v0  ;;  %v964_v41 = vmul.f32 1.442695, %v911_v21  ;;  %v680_v40 = vsel %vm665_vm0, 0.0, %v628_v10 }
 0x1a1   : > { %v1346_v36 = vpop.eup %1345  ;;  %v991_v52 = vmul.f32 %v1344_v5, %v1579_v31  ;;  %1371 = vpow2.f32 %v930_v27  ;;  %v679_v32 = vsel %vm665_vm0, 0.0, %v626_v51  ;;  %v802_v37 = vadd.f32 2.0, %v770_v47 }
 0x1a2   : > { %v1348_v58 = vpop.eup %1347  ;;  %1068 = vst [vmem:[%s1947_s15 + $0x90] sm:$0xff] %v1023_v1  ;;  %1373 = vrcp.f32 %v1346_v36  ;;  %v786_v31 = vmul.f32 0.0001, %v754_v18  ;;  %v712_v9 = vadd.f32 %v680_v40, %v1803_v4  ;;  %v745_v48 = vmul.f32 0.5, %v713_v35 }
 0x1a3   : > { %v1350_v25 = vpop.eup %1349  ;;  %1052 = vst [vmem:[%s1947_s15 + $0x10] sm:$0xff] %v991_v52  ;;  %1375 = vrcp.f32 %v1348_v58  ;;  %v711_v61 = vadd.f32 %v679_v32, %v1828_v45  ;;  %v1966_v56 = vadd.f32 2.0, %v787_v13  ;;  %v695_v1 = vsel %vm665_vm0, 0.0, %v658_v6 }
 0x1a4   : > { %v1352_v39 = vpop.eup %1351  ;;  %v993_v42 = vmul.f32 %v1350_v25, %v1597_v43  ;;  %1377 = vpow2.f32 %v964_v41  ;;  %v744_v0 = vmul.f32 0.5, %v712_v9  ;;  %v818_v43 = vadd.f32 2.0, %v786_v31  ;;  %v662_v41 = vpop.permute.xlu1 %661 }
 0x1a5   : > { %v1354_v10 = vpop.eup %1353  ;;  %v987_v55 = vmul.f32 %v1352_v39, %v1586_v38  ;;  %1379 = vlog2.f32 %v1931_v29  ;;  %v777_v27 = vmul.f32 0.0001, %v745_v48  ;;  %v678_v29 = vsel %vm665_vm0, 0.0, %v624_v57 }
 0x1a6   : > { %v1356_v8 = vpop.eup %1355  ;;  %1053 = vst [vmem:[%s1947_s15 + $0x18] sm:$0xff] %v993_v42  ;;  %v867_v4 = vmul.f32 0.6931472, %v1354_v10  ;;  %1381 = vlog2.f32 %v1935_v53  ;;  %v776_v38 = vmul.f32 0.0001, %v744_v0  ;;  %v743_v49 = vmul.f32 0.5, %v711_v61 }
 0x1a7   : > { %v1358_v26 = vpop.eup %1357  ;;  %1050 = vst [vmem:[%s1947_s15] sm:$0xff] %v987_v55  ;;  %v849_v45 = vmul.f32 0.6931472, %v1356_v8  ;;  %1383 = vlog2.f32 %v820_v16  ;;  %v809_v2 = vadd.f32 2.0, %v777_v27  ;;  %v710_v57 = vadd.f32 %v678_v29, %v1824_v15 }
 0x1a8   : > { %v1360_v63 = vpop.eup %1359  ;;  %v1025_v21 = vmul.f32 %v1358_v26, %v1613_v50  ;;  %v910_v47 = vmul.f32 0.75, %v867_v4  ;;  %1385 = vlog2.f32 %v803_v54  ;;  %v808_v51 = vadd.f32 2.0, %v776_v38  ;;  %v660_v54 = vpop.permute.xlu0 %659 }
 0x1a9   : > { %v1362_v20 = vpop.eup %1361  ;;  %v1019_v53 = vmul.f32 %v1360_v63, %v1603_v46  ;;  %v901_v22 = vmul.f32 0.75, %v849_v45  ;;  %1387 = vlog2.f32 %v802_v37  ;;  %v694_v46 = vsel %vm665_vm0, 0.0, %v656_v33 }
 0x1aa   : > { %v1364_v44 = vpop.eup %1363  ;;  %1069 = vst [vmem:[%s1947_s15 + $0x98] sm:$0xff] %v1025_v21  ;;  %1389 = vrcp.f32 %v1362_v20  ;;  %v962_v16 = vmul.f32 1.442695, %v910_v47  ;;  %v775_v13 = vmul.f32 0.0001, %v743_v49  ;;  %v742_v15 = vmul.f32 0.5, %v710_v57 }
 0x1ab   : > { %v1366_v5 = vpop.eup %1365  ;;  %1066 = vst [vmem:[%s1947_s15 + $0x80] sm:$0xff] %v1019_v53  ;;  %1391 = vrcp.f32 %v1364_v44  ;;  %v944_v50 = vmul.f32 1.442695, %v901_v22  ;;  %v727_v35 = vadd.f32 %v695_v1, %v1847_v17  ;;  %v726_v40 = vadd.f32 %v694_v46, %v1841_v11 }
 0x1ac   : > { %v1368_v36 = vpop.eup %1367  ;;  %v1021_v52 = vmul.f32 %v1366_v5, %v1632_v60  ;;  %1393 = vpow2.f32 %v962_v16  ;;  %v774_v25 = vmul.f32 0.0001, %v742_v15  ;;  %v697_v37 = vsel %vm665_vm0, 0.0, %v662_v41 }
 0x1ad   : > { %v1370_v18 = vpop.eup %1369  ;;  %v989_v58 = vmul.f32 %v1368_v36, %v1630_v59  ;;  %1395 = vpow2.f32 %v944_v50  ;;  %v696_v60 = vsel %vm665_vm0, 0.0, %v660_v54  ;;  %v759_v59 = vmul.f32 0.5, %v727_v35 }
 0x1ae   : > { %v1372_v32 = vpop.eup %1371  ;;  %1067 = vst [vmem:[%s1947_s15 + $0x88] sm:$0xff] %v1021_v52  ;;  %1397 = vrcp.f32 %v1370_v18  ;;  %v758_v9 = vmul.f32 0.5, %v726_v40  ;;  %v729_v17 = vadd.f32 %v697_v37, %v1859_v34  ;;  %v807_v42 = vadd.f32 2.0, %v775_v13 }
 0x1af   : > { %v1374_v31 = vpop.eup %1373  ;;  %1051 = vst [vmem:[%s1947_s15 + $0x8] sm:$0xff] %v989_v58  ;;  %1399 = vrcp.f32 %v1372_v32  ;;  %v728_v48 = vadd.f32 %v696_v60, %v1855_v24  ;;  %v791_v10 = vmul.f32 0.0001, %v759_v59  ;;  %v806_v6 = vadd.f32 2.0, %v774_v25 }
 0x1b0   : > { %v1376_v39 = vpop.eup %1375  ;;  %v1001_v11 = vmul.f32 %v1374_v31, %v1650_v3  ;;  %1401 = vlog2.f32 %v1966_v56  ;;  %v790_v55 = vmul.f32 0.0001, %v758_v9  ;;  %v761_v34 = vmul.f32 0.5, %v729_v17 }
 0x1b1   : > { %v1378_v61 = vpop.eup %1377  ;;  %v999_v30 = vmul.f32 %v1376_v39, %v1639_v62  ;;  %1403 = vlog2.f32 %v818_v43  ;;  %v760_v33 = vmul.f32 0.5, %v728_v48  ;;  %v823_v56 = vadd.f32 2.0, %v791_v10 }
 0x1b2   : > { %v1380_v0 = vpop.eup %1379  ;;  %1057 = vst [vmem:[%s1947_s15 + $0x38] sm:$0xff] %v1001_v11  ;;  %1405 = vrcp.f32 %v1378_v61  ;;  %v822_v24 = vadd.f32 2.0, %v790_v55  ;;  %v793_v45 = vmul.f32 0.0001, %v761_v34 }
 0x1b3   : > { %v1382_v8 = vpop.eup %1381  ;;  %1056 = vst [vmem:[%s1947_s15 + $0x30] sm:$0xff] %v999_v30  ;;  %v847_v3 = vmul.f32 0.6931472, %v1380_v0  ;;  %1407 = vlog2.f32 %v809_v2  ;;  %v792_v21 = vmul.f32 0.0001, %v760_v33 }
 0x1b4   : > { %v1384_v4 = vpop.eup %1383  ;;  %v881_v27 = vmul.f32 0.6931472, %v1382_v8  ;;  %1409 = vlog2.f32 %v808_v51  ;;  %v825_v52 = vadd.f32 2.0, %v793_v45 }
 0x1b5   : > { %v1386_v26 = vpop.eup %1385  ;;  %v900_v62 = vmul.f32 0.75, %v847_v3  ;;  %v879_v43 = vmul.f32 0.6931472, %v1384_v4  ;;  %1411 = vlog2.f32 %v807_v42  ;;  %v824_v15 = vadd.f32 2.0, %v792_v21 }
 0x1b6   : > { %v1388_v38 = vpop.eup %1387  ;;  %v917_v29 = vmul.f32 0.75, %v881_v27  ;;  %v845_v63 = vmul.f32 0.6931472, %v1386_v26  ;;  %1413 = vlog2.f32 %v806_v6  ;;  %v2082_v26 = vld [vmem:[#allocation3_spill] sm:$0xff] }
 0x1b7   : > { %v1390_v47 = vpop.eup %1389  ;;  %v942_v49 = vmul.f32 1.442695, %v900_v62  ;;  %v916_v20 = vmul.f32 0.75, %v879_v43  ;;  %v843_v53 = vmul.f32 0.6931472, %v1388_v38  ;;  %1415 = vlog2.f32 %v823_v56 }
 0x1b8   : > { %v1392_v22 = vpop.eup %1391  ;;  %v1033_v2 = vmul.f32 %v1390_v47, %v1669_v12  ;;  %v976_v44 = vmul.f32 1.442695, %v917_v29  ;;  %v899_v16 = vmul.f32 0.75, %v845_v63  ;;  %1417 = vlog2.f32 %v822_v24 }
 0x1b9   : > { %v1394_v51 = vpop.eup %1393  ;;  %v1031_v57 = vmul.f32 %v1392_v22, %v1658_v7  ;;  %1419 = vpow2.f32 %v942_v49  ;;  %v974_v5 = vmul.f32 1.442695, %v916_v20  ;;  %v898_v50 = vmul.f32 0.75, %v843_v53 }
 0x1ba   : > { %v1396_v1 = vpop.eup %1395  ;;  %1073 = vst [vmem:[%s1947_s15 + $0xb8] sm:$0xff] %v1033_v2  ;;  %1421 = vrcp.f32 %v1394_v51  ;;  %v940_v46 = vmul.f32 1.442695, %v899_v16 }
 0x1bb   : > { %v1398_v41 = vpop.eup %1397  ;;  %1072 = vst [vmem:[%s1947_s15 + $0xb0] sm:$0xff] %v1031_v57  ;;  %1423 = vrcp.f32 %v1396_v1  ;;  %v938_v54 = vmul.f32 1.442695, %v898_v50 }
 0x1bc   : > { %v1400_v12 = vpop.eup %1399  ;;  %v997_v36 = vmul.f32 %v1398_v41, %v1682_v19  ;;  %1425 = vpow2.f32 %v976_v44 }
 0x1bd   : > { %v1402_v13 = vpop.eup %1401  ;;  %v995_v7 = vmul.f32 %v1400_v12, %v1675_v14  ;;  %1427 = vpow2.f32 %v974_v5 }
 0x1be   : > { %v1404_v18 = vpop.eup %1403  ;;  %1055 = vst [vmem:[%s1947_s15 + $0x28] sm:$0xff] %v997_v36  ;;  %1429 = vpow2.f32 %v940_v46  ;;  %v877_v58 = vmul.f32 0.6931472, %v1402_v13  ;;  %v2083_v46 = vld [vmem:[#allocation2_spill] sm:$0xff] }
 0x1bf   : > { %v1406_v35 = vpop.eup %1405  ;;  %1054 = vst [vmem:[%s1947_s15 + $0x20] sm:$0xff] %v995_v7  ;;  %1431 = vpow2.f32 %v938_v54  ;;  %v875_v40 = vmul.f32 0.6931472, %v1404_v18 }
 0x1c0   : > { %v1408_v32 = vpop.eup %1407  ;;  %v1029_v25 = vmul.f32 %v1406_v35, %v1703_v28  ;;  %v915_v19 = vmul.f32 0.75, %v877_v58  ;;  %1433 = vlog2.f32 %v825_v52  ;;  %v2084_v52 = vld [vmem:[#allocation5_spill] sm:$0xff]  ;;  %v2086_v35 = vld [vmem:[#allocation7_spill] sm:$0xff] }
 0x1c1   : > { %v1410_v37 = vpop.eup %1409  ;;  %v914_v60 = vmul.f32 0.75, %v875_v40  ;;  %v857_v31 = vmul.f32 0.6931472, %v1408_v32  ;;  %1435 = vlog2.f32 %v824_v15  ;;  %v2085_v15 = vld [vmem:[#allocation4_spill] sm:$0xff] }
 0x1c2   : > { %v1412_v14 = vpop.eup %1411  ;;  %1071 = vst [vmem:[%s1947_s15 + $0xa8] sm:$0xff] %v1029_v25  ;;  %v972_v59 = vmul.f32 1.442695, %v915_v19  ;;  %v855_v9 = vmul.f32 0.6931472, %v1410_v37  ;;  %v2087_v25 = vld [vmem:[#allocation6_spill] sm:$0xff] }
 0x1c3   : > { %v1414_v17 = vpop.eup %1413  ;;  %v970_v39 = vmul.f32 1.442695, %v914_v60  ;;  %v905_v11 = vmul.f32 0.75, %v857_v31  ;;  %v853_v42 = vmul.f32 0.6931472, %v1412_v14 }
 0x1c4   : > { %v1416_v48 = vpop.eup %1415  ;;  %1437 = vpow2.f32 %v972_v59  ;;  %v904_v61 = vmul.f32 0.75, %v855_v9  ;;  %v851_v30 = vmul.f32 0.6931472, %v1414_v17  ;;  %v2088_v9 = vld [vmem:[#allocation9_spill] sm:$0xff] }
 0x1c5   : > { %v1418_v10 = vpop.eup %1417  ;;  %1439 = vpow2.f32 %v970_v39  ;;  %v952_v28 = vmul.f32 1.442695, %v905_v11  ;;  %v885_v55 = vmul.f32 0.6931472, %v1416_v48  ;;  %v903_v34 = vmul.f32 0.75, %v853_v42  ;;  %v2089_v11 = vld [vmem:[#allocation8_spill] sm:$0xff] }
 0x1c6   : > { %v1420_v0 = vpop.eup %1419  ;;  %v950_v6 = vmul.f32 1.442695, %v904_v61  ;;  %v883_v33 = vmul.f32 0.6931472, %v1418_v10  ;;  %v902_v3 = vmul.f32 0.75, %v851_v30  ;;  %v2090_v10 = vld [vmem:[#allocation11_spill] sm:$0xff] }
 0x1c7   : > { %v1422_v8 = vpop.eup %1421  ;;  %1441 = vrcp.f32 %v1420_v0  ;;  %v919_v27 = vmul.f32 0.75, %v885_v55  ;;  %v948_v38 = vmul.f32 1.442695, %v903_v34  ;;  %v2091_v55 = vld [vmem:[#allocation10_spill] sm:$0xff] }
 0x1c8   : > { %v1424_v56 = vpop.eup %1423  ;;  %v1027_v4 = vmul.f32 %v1422_v8, %v1697_v23  ;;  %1443 = vpow2.f32 %v952_v28  ;;  %v918_v43 = vmul.f32 0.75, %v883_v33  ;;  %v946_v63 = vmul.f32 1.442695, %v902_v3  ;;  %v2092_v33 = vld [vmem:[#allocation13_spill] sm:$0xff] }
 0x1c9   : > { %v1426_v24 = vpop.eup %1425  ;;  %v1009_v62 = vmul.f32 %v1424_v56, %v2082_v26  ;;  %1445 = vpow2.f32 %v950_v6  ;;  %v980_v47 = vmul.f32 1.442695, %v919_v27  ;;  %v2093_v56 = vld [vmem:[#allocation12_spill] sm:$0xff] }
 0x1ca   : > { %v1428_v45 = vpop.eup %1427  ;;  %1070 = vst [vmem:[%s1947_s15 + $0xa0] sm:$0xff] %v1027_v4  ;;  %1447 = vrcp.f32 %v1426_v24  ;;  %v978_v23 = vmul.f32 1.442695, %v918_v43  ;;  %v2094_v24 = vld [vmem:[#allocation15_spill] sm:$0xff] }
 0x1cb   : > { %v1430_v29 = vpop.eup %1429  ;;  %1061 = vst [vmem:[%s1947_s15 + $0x58] sm:$0xff] %v1009_v62  ;;  %1449 = vrcp.f32 %v1428_v45  ;;  %v2095_v62 = vld [vmem:[#allocation14_spill] sm:$0xff] }
 0x1cc   : > { %v1432_v21 = vpop.eup %1431  ;;  %1451 = vrcp.f32 %v1430_v29  ;;  %v2096_v29 = vld [vmem:[#allocation17_spill] sm:$0xff] }
 0x1cd   : > { %v1434_v49 = vpop.eup %1433  ;;  %1453 = vrcp.f32 %v1432_v21  ;;  %v2097_v21 = vld [vmem:[#allocation16_spill] sm:$0xff] }
 0x1ce   : > { %v1436_v20 = vpop.eup %1435  ;;  %1455 = vpow2.f32 %v948_v38  ;;  %v889_v53 = vmul.f32 0.6931472, %v1434_v49 }
 0x1cf   : > { %1457 = vpow2.f32 %v946_v63  ;;  %v887_v22 = vmul.f32 0.6931472, %v1436_v20 }
 0x1d0   : > { %1459 = vpow2.f32 %v980_v47  ;;  %v921_v2 = vmul.f32 0.75, %v889_v53 }
 0x1d1   : > { %v1438_v44 = vpop.eup %1437  ;;  %1461 = vpow2.f32 %v978_v23  ;;  %v920_v16 = vmul.f32 0.75, %v887_v22 }
 0x1d2   : > { %v1440_v51 = vpop.eup %1439  ;;  %1463 = vrcp.f32 %v1438_v44  ;;  %v984_v57 = vmul.f32 1.442695, %v921_v2 }
 0x1d3   : > { %1465 = vrcp.f32 %v1440_v51  ;;  %v982_v5 = vmul.f32 1.442695, %v920_v16 }
 0x1d4   : > { %v1442_v50 = vpop.eup %1441  ;;  %1467 = vpow2.f32 %v984_v57 }
 0x1d5   : > { %v1444_v1 = vpop.eup %1443  ;;  %v1007_v41 = vmul.f32 %v1442_v50, %v2083_v46  ;;  %1469 = vpow2.f32 %v982_v5 }
 0x1d6   : > { %v1446_v54 = vpop.eup %1445  ;;  %1471 = vrcp.f32 %v1444_v1 }
 0x1d7   : > { %v1448_v12 = vpop.eup %1447  ;;  %1060 = vst [vmem:[%s1947_s15 + $0x50] sm:$0xff] %v1007_v41  ;;  %1473 = vrcp.f32 %v1446_v54 }
 0x1d8   : > { %v1450_v36 = vpop.eup %1449  ;;  %v1041_v13 = vmul.f32 %v1448_v12, %v2084_v52 }
 0x1d9   : > { %v1452_v7 = vpop.eup %1451  ;;  %v1039_v18 = vmul.f32 %v1450_v36, %v2085_v15 }
 0x1da   : > { %v1454_v58 = vpop.eup %1453  ;;  %1077 = vst [vmem:[%s1947_s15 + $0xd8] sm:$0xff] %v1041_v13  ;;  %v1005_v40 = vmul.f32 %v1452_v7, %v2086_v35 }
 0x1db   : > { %v1456_v32 = vpop.eup %1455  ;;  %1076 = vst [vmem:[%s1947_s15 + $0xd0] sm:$0xff] %v1039_v18  ;;  %v1003_v19 = vmul.f32 %v1454_v58, %v2087_v25 }
 0x1dc   : > { %v1458_v37 = vpop.eup %1457  ;;  %1059 = vst [vmem:[%s1947_s15 + $0x48] sm:$0xff] %v1005_v40  ;;  %1475 = vrcp.f32 %v1456_v32 }
 0x1dd   : > { %v1460_v60 = vpop.eup %1459  ;;  %1058 = vst [vmem:[%s1947_s15 + $0x40] sm:$0xff] %v1003_v19  ;;  %1477 = vrcp.f32 %v1458_v37 }
 0x1de   : > { %v1462_v31 = vpop.eup %1461  ;;  %1479 = vrcp.f32 %v1460_v60 }
 0x1df   : > { %v1464_v14 = vpop.eup %1463  ;;  %1481 = vrcp.f32 %v1462_v31 }
 0x1e0   : > { %v1466_v59 = vpop.eup %1465  ;;  %v1037_v17 = vmul.f32 %v1464_v14, %v2088_v9 }
 0x1e1   : > { %v1468_v39 = vpop.eup %1467  ;;  %v1035_v42 = vmul.f32 %v1466_v59, %v2089_v11 }
 0x1e2   : > { %v1470_v48 = vpop.eup %1469  ;;  %1075 = vst [vmem:[%s1947_s15 + $0xc8] sm:$0xff] %v1037_v17  ;;  %1483 = vrcp.f32 %v1468_v39 }
 0x1e3   : > { %v1472_v61 = vpop.eup %1471  ;;  %1074 = vst [vmem:[%s1947_s15 + $0xc0] sm:$0xff] %v1035_v42  ;;  %1485 = vrcp.f32 %v1470_v48 }
 0x1e4   : > { %v1474_v30 = vpop.eup %1473  ;;  %v1017_v28 = vmul.f32 %v1472_v61, %v2090_v10 }
 0x1e5   : > { %v1015_v0 = vmul.f32 %v1474_v30, %v2091_v55 }
 0x1e6   : > { %1065 = vst [vmem:[%s1947_s15 + $0x78] sm:$0xff] %v1017_v28 }
 0x1e7   : > { %1064 = vst [vmem:[%s1947_s15 + $0x70] sm:$0xff] %v1015_v0 }
 0x1e9   : > { %v1476_v6 = vpop.eup %1475 }
 0x1ea   : > { %v1478_v34 = vpop.eup %1477  ;;  %v1013_v8 = vmul.f32 %v1476_v6, %v2092_v33 }
 0x1eb   : > { %v1480_v3 = vpop.eup %1479  ;;  %v1011_v4 = vmul.f32 %v1478_v34, %v2093_v56 }
 0x1ec   : > { %v1482_v27 = vpop.eup %1481  ;;  %1063 = vst [vmem:[%s1947_s15 + $0x68] sm:$0xff] %v1013_v8  ;;  %v1045_v26 = vmul.f32 %v1480_v3, %v2094_v24 }
 0x1ed   : > { %1062 = vst [vmem:[%s1947_s15 + $0x60] sm:$0xff] %v1011_v4  ;;  %v1043_v43 = vmul.f32 %v1482_v27, %v2095_v62 }
 0x1ee   : > { %1079 = vst [vmem:[%s1947_s15 + $0xe8] sm:$0xff] %v1045_v26 }
 0x1ef   : > { %v1484_v45 = vpop.eup %1483  ;;  %1078 = vst [vmem:[%s1947_s15 + $0xe0] sm:$0xff] %v1043_v43 }
 0x1f0   : > { %v1486_v38 = vpop.eup %1485  ;;  %v1049_v63 = vmul.f32 %v1484_v45, %v2096_v29 }
 0x1f1   : > { %v1047_v47 = vmul.f32 %v1486_v38, %v2097_v21 }
 0x1f2   : > { %1081 = vst [vmem:[%s1947_s15 + $0xf8] sm:$0xff] %v1049_v63 }
 0x1f3   : > { %1080 = vst [vmem:[%s1947_s15 + $0xf0] sm:$0xff] %v1047_v47 }
 0x1f4 PF: > { %s13_s12 = sadd.s32 1, %s1493_s12  }
 0x1f5   : > { %p10_p4 = scmp.ge.s32.totalorder %s13_s12, 4  }
 0x1f7   :  { %12 = sbr.rel (!%p10_p4) target bundleno = 1 (0x1), region = 62 }

// kernel: imagenet_forward.9
= control target key start
LH: loop header
LB: loop body
LE: loop exit
PB: predicated region body
PF: predicated region fallthrough
CT: control target
= control target key end

     0   :  { %s1253_s1 = inlined_call_operand.vmem [shape: bf16[256,128], index: 1, kind: input, shape index: {}]   ;;  %s1254_s0 = inlined_call_operand.vmem [shape: bf16[128,256], index: 0, kind: input, shape index: {}]   ;;  %s1255_s2 = inlined_call_operand.vmem [shape: f32[1,128], index: 2, kind: input, shape index: {}]   ;;  %s1256_s3 = inlined_call_operand.vmem [shape: f32[128,128], index: 3, kind: output, shape index: {}]  }
   0x1   :  { %v736_v0 = vld [vmem:[%s1253_s1 + $0x78] sm:$0xff]   ;;  %v738_v2 = vld [vmem:[%s1253_s1 + $0x70] sm:$0xff]   ;;  %v740_v4 = vld [vmem:[%s1253_s1 + $0x68] sm:$0xff]  }
   0x2   :  { %v737_v1 = vld [vmem:[%s1253_s1 + $0x38] sm:$0xff]   ;;  %655 = vmatprep.subr.bf16.mxu0 %v736_v0  ;;  %719 = vmatprep.subr.bf16.mxu1 %v736_v0  ;;  %v739_v3 = vld [vmem:[%s1253_s1 + $0x30] sm:$0xff]   ;;  %v741_v5 = vld [vmem:[%s1253_s1 + $0x28] sm:$0xff]  }
   0x3   :  { %656 = vmatpush3.bf16.msra.mxu0 %v737_v1  ;;  %727 = vmatpush3.bf16.msra.mxu1 %v737_v1  ;;  %v742_v6 = vld [vmem:[%s1253_s1 + $0x60] sm:$0xff]   ;;  %v744_v8 = vld [vmem:[%s1253_s1 + $0x58] sm:$0xff]   ;;  %v746_v10 = vld [vmem:[%s1253_s1 + $0x50] sm:$0xff]  }
   0x4   :  { %657 = vmatprep.subr.bf16.mxu0 %v738_v2  ;;  %720 = vmatprep.subr.bf16.mxu1 %v738_v2  ;;  %v743_v7 = vld [vmem:[%s1253_s1 + $0x20] sm:$0xff]   ;;  %v745_v9 = vld [vmem:[%s1253_s1 + $0x18] sm:$0xff]   ;;  %v747_v13 = vld [vmem:[%s1253_s1 + $0x10] sm:$0xff]  }
   0x5   :  { %v754_v11 = vld [vmem:[%s1254_s0 + $0x4] ss:$8 sps:$4 sm:$0xff]   ;;  %v752_v18 = vld [vmem:[%s1254_s0] ss:$8 sps:$4 sm:$0xff]   ;;  %v758_v20 = vld [vmem:[%s1254_s0 + $0x14] ss:$8 sps:$4 sm:$0xff]  }
   0x6   :  { %v757_v12 = vld [vmem:[%s1254_s0 + $0x44] ss:$8 sps:$4 sm:$0xff]   ;;  %278 = vmatprep.mubr.bf16.mxu0 %v754_v11  ;;  %v755_v19 = vld [vmem:[%s1254_s0 + $0x40] ss:$8 sps:$4 sm:$0xff]   ;;  %v760_v21 = vld [vmem:[%s1254_s0 + $0x54] ss:$8 sps:$4 sm:$0xff]  }
   0x7   :  { %658 = vmatpush3.bf16.msra.mxu0 %v739_v3  ;;  %728 = vmatpush3.bf16.msra.mxu1 %v739_v3  ;;  %v748_v14 = vld [vmem:[%s1253_s1 + $0x48] sm:$0xff]   ;;  %v750_v16 = vld [vmem:[%s1253_s1 + $0x40] sm:$0xff]   ;;  %v762_v22 = vld [vmem:[%s1254_s0 + $0x10] ss:$8 sps:$4 sm:$0xff]  }
   0x8   :  { %659 = vmatprep.subr.bf16.mxu0 %v740_v4  ;;  %721 = vmatprep.subr.bf16.mxu1 %v740_v4  ;;  %v749_v15 = vld [vmem:[%s1253_s1 + $0x8] sm:$0xff]   ;;  %v751_v17 = vld [vmem:[%s1253_s1] sm:$0xff]   ;;  %v763_v23 = vld [vmem:[%s1254_s0 + $0x50] ss:$8 sps:$4 sm:$0xff]  }
   0x9   :  { %310 = vmatprep.mubr.bf16.mxu1 %v757_v12  ;;  %v764_v24 = vld [vmem:[%s1254_s0 + $0x24] ss:$8 sps:$4 sm:$0xff]   ;;  %v768_v26 = vld [vmem:[%s1254_s0 + $0x20] ss:$8 sps:$4 sm:$0xff]   ;;  %v770_v28 = vld [vmem:[%s1254_s0 + $0x34] ss:$8 sps:$4 sm:$0xff]  }
   0xa   :  { %v766_v25 = vld [vmem:[%s1254_s0 + $0x64] ss:$8 sps:$4 sm:$0xff]   ;;  %v769_v27 = vld [vmem:[%s1254_s0 + $0x60] ss:$8 sps:$4 sm:$0xff]   ;;  %v772_v29 = vld [vmem:[%s1254_s0 + $0x74] ss:$8 sps:$4 sm:$0xff]  }
   0xb   :  { %660 = vmatpush3.bf16.msra.mxu0 %v741_v5  ;;  %729 = vmatpush3.bf16.msra.mxu1 %v741_v5  ;;  %v774_v30 = vld [vmem:[%s1254_s0 + $0x30] ss:$8 sps:$4 sm:$0xff]   ;;  %v992_v34 = vld [vmem:[%s1255_s2] ss:$0 sm:$0xff] }
   0xc   :  { %661 = vmatprep.subr.bf16.mxu0 %v742_v6  ;;  %722 = vmatprep.subr.bf16.mxu1 %v742_v6  ;;  %v775_v31 = vld [vmem:[%s1254_s0 + $0x70] ss:$8 sps:$4 sm:$0xff]   ;;  %s872_s0 = smov 1  }
   0xf   :  { %662 = vmatpush3.bf16.msra.mxu0 %v743_v7  ;;  %730 = vmatpush3.bf16.msra.mxu1 %v743_v7 }
  0x10   :  { %663 = vmatprep.subr.bf16.mxu0 %v744_v8  ;;  %723 = vmatprep.subr.bf16.mxu1 %v744_v8 }
  0x13   :  { %664 = vmatpush3.bf16.msra.mxu0 %v745_v9  ;;  %731 = vmatpush3.bf16.msra.mxu1 %v745_v9 }
  0x14   :  { %665 = vmatprep.subr.bf16.mxu0 %v746_v10  ;;  %724 = vmatprep.subr.bf16.mxu1 %v746_v10 }
  0x17   :  { %666 = vmatpush3.bf16.msra.mxu0 %v747_v13  ;;  %732 = vmatpush3.bf16.msra.mxu1 %v747_v13 }
  0x18   :  { %667 = vmatprep.subr.bf16.mxu0 %v748_v14  ;;  %725 = vmatprep.subr.bf16.mxu1 %v748_v14 }
  0x1b   :  { %668 = vmatpush3.bf16.msra.mxu0 %v749_v15  ;;  %733 = vmatpush3.bf16.msra.mxu1 %v749_v15 }
  0x1c   :  { %669 = vmatprep.subr.bf16.mxu0 %v750_v16  ;;  %726 = vmatprep.subr.bf16.mxu1 %v750_v16 }
  0x1f   :  { %670 = vmatpush3.bf16.msra.mxu0 %v751_v17  ;;  %734 = vmatpush3.bf16.msra.mxu1 %v751_v17 }
  0x22   :  { %279 = vmatmul.mubr.bf16.vlgmr.msra.gmra.mxu0 %v752_v18  ;;  %311 = vmatmul.mubr.bf16.vlgmr.msra.gmra.mxu1 %v755_v19 }
  0x23   :  { %286 = vmatprep.mubr.bf16.mxu0 %v758_v20  ;;  %318 = vmatprep.mubr.bf16.mxu1 %v760_v21 }
  0x2a   :  { %287 = vmatmul.mubr.bf16.gmra.mxu0 %v762_v22  ;;  %319 = vmatmul.mubr.bf16.gmra.mxu1 %v763_v23 }
  0x2b   :  { %294 = vmatprep.mubr.bf16.mxu0 %v764_v24  ;;  %326 = vmatprep.mubr.bf16.mxu1 %v766_v25 }
  0x32   :  { %295 = vmatmul.mubr.bf16.gmra.mxu0 %v768_v26  ;;  %327 = vmatmul.mubr.bf16.gmra.mxu1 %v769_v27 }
  0x33   :  { %302 = vmatprep.mubr.bf16.mxu0 %v770_v28  ;;  %334 = vmatprep.mubr.bf16.mxu1 %v772_v29 }
  0x3a   :  { %303 = vmatmul.mubr.bf16.gmra.mxu0 %v774_v30  ;;  %335 = vmatmul.mubr.bf16.gmra.mxu1 %v775_v31 }
  0xe2   :  { %v671_v32 = vpop.f32.mrf.mxu0  ;;  %v695_v33 = vpop.f32.mrf.mxu1 }
  0xe4   :  { %v672_v35 = vpop.f32.mrf.mxu0  ;;  %v696_v36 = vpop.f32.mrf.mxu1 }
  0xe5   :  { %v673_v37 = vadd.f32 %v672_v35, %v671_v32  ;;  %v697_v38 = vadd.f32 %v696_v36, %v695_v33 }
  0xe6   :  { %v674_v39 = vpop.f32.mrf.mxu0  ;;  %v698_v40 = vpop.f32.mrf.mxu1 }
  0xe7   :  { %v281_v41 = vadd.f32 %v673_v37, %v992_v34  ;;  %v313_v42 = vadd.f32 %v697_v38, %v992_v34 }
  0xe8   :  { %v675_v43 = vpop.f32.mrf.mxu0  ;;  %v699_v44 = vpop.f32.mrf.mxu1 }
  0xe9   :  { %v996_v45 = vmax.f32 %v281_v41, 0.0  ;;  %v676_v46 = vadd.f32 %v675_v43, %v674_v39  ;;  %v700_v47 = vadd.f32 %v699_v44, %v698_v40  ;;  %v998_v50 = vmax.f32 %v313_v42, 0.0 }
  0xea   :  { %v677_v48 = vpop.f32.mrf.mxu0  ;;  %v701_v49 = vpop.f32.mrf.mxu1 }
  0xeb   :  { %v284_v51 = vadd.f32 %v676_v46, %v992_v34  ;;  %v316_v52 = vadd.f32 %v700_v47, %v992_v34  ;;  %v1004_v53 = vmul.f32 %v996_v45, %v996_v45  ;;  %v1020_v1 = vmul.f32 %v998_v50, %v998_v50 }
  0xec   :  { %v678_v54 = vpop.f32.mrf.mxu0  ;;  %v702_v55 = vpop.f32.mrf.mxu1 }
  0xed   :  { %v1006_v56 = vmax.f32 %v316_v52, 0.0  ;;  %v679_v57 = vadd.f32 %v678_v54, %v677_v48  ;;  %v703_v58 = vadd.f32 %v702_v55, %v701_v49  ;;  %375 = vrot.lane.b32.xlu0 %v1004_v53, %s872_s0  ;;  %v1010_v59 = vmax.f32 %v284_v51, 0.0 }
  0xee   :  { %v680_v60 = vpop.f32.mrf.mxu0  ;;  %v704_v61 = vpop.f32.mrf.mxu1 }
  0xef   :  { %v289_v62 = vadd.f32 %v679_v57, %v992_v34  ;;  %v321_v63 = vadd.f32 %v703_v58, %v992_v34  ;;  %v1016_v0 = vmul.f32 %v1006_v56, %v1006_v56  ;;  %v1030_v9 = vmul.f32 %v1010_v59, %v1010_v59 }
  0xf0   :  { %v681_v2 = vpop.f32.mrf.mxu0  ;;  %v705_v3 = vpop.f32.mrf.mxu1 }
  0xf1   :  { %v1022_v4 = vmax.f32 %v289_v62, 0.0  ;;  %v682_v5 = vadd.f32 %v681_v2, %v680_v60  ;;  %v706_v6 = vadd.f32 %v705_v3, %v704_v61  ;;  %393 = vrot.lane.b32.xlu1 %v1016_v0, %s872_s0  ;;  %391 = vrot.lane.b32.xlu0 %v1020_v1, %s872_s0  ;;  %v1032_v10 = vmax.f32 %v321_v63, 0.0 }
  0xf2   :  { %v683_v7 = vpop.f32.mrf.mxu0  ;;  %v707_v8 = vpop.f32.mrf.mxu1 }
  0xf3   :  { %v292_v11 = vadd.f32 %v682_v5, %v992_v34  ;;  %v324_v12 = vadd.f32 %v706_v6, %v992_v34  ;;  %v1038_v13 = vmul.f32 %v1022_v4, %v1022_v4  ;;  %v1056_v25 = vmul.f32 %v1032_v10, %v1032_v10 }
  0xf4   :  { %v684_v14 = vpop.f32.mrf.mxu0  ;;  %v708_v15 = vpop.f32.mrf.mxu1 }
  0xf5   :  { %v1040_v16 = vmax.f32 %v292_v11, 0.0  ;;  %v685_v17 = vadd.f32 %v684_v14, %v683_v7  ;;  %v709_v18 = vadd.f32 %v708_v15, %v707_v8  ;;  %379 = vrot.lane.b32.xlu1 %v1038_v13, %s872_s0  ;;  %377 = vrot.lane.b32.xlu0 %v1030_v9, %s872_s0  ;;  %v1046_v19 = vmax.f32 %v324_v12, 0.0 }
  0xf6   :  { %v686_v20 = vpop.f32.mrf.mxu0  ;;  %v710_v21 = vpop.f32.mrf.mxu1  ;;  %v407_v11 = vlaneseq }
  0xf7   :  { %v297_v22 = vadd.f32 %v685_v17, %v992_v34  ;;  %v329_v23 = vadd.f32 %v709_v18, %v992_v34  ;;  %v1052_v24 = vmul.f32 %v1040_v16, %v1040_v16  ;;  %v1066_v33 = vmul.f32 %v1046_v19, %v1046_v19 }
  0xf8   :  { %v687_v26 = vpop.f32.mrf.mxu0  ;;  %v711_v27 = vpop.f32.mrf.mxu1  ;;  %v1138_v12 = vand.u32 127, %v407_v11 }
  0xf9   :  { %v1058_v28 = vmax.f32 %v297_v22, 0.0  ;;  %v688_v29 = vadd.f32 %v687_v26, %v686_v20  ;;  %v712_v30 = vadd.f32 %v711_v27, %v710_v21  ;;  %381 = vrot.lane.b32.xlu1 %v1052_v24, %s872_s0  ;;  %395 = vrot.lane.b32.xlu0 %v1056_v25, %s872_s0  ;;  %v1068_v35 = vmax.f32 %v329_v23, 0.0 }
  0xfa   :  { %v689_v31 = vpop.f32.mrf.mxu0  ;;  %v713_v32 = vpop.f32.mrf.mxu1  ;;  %vm409_vm0 = vcmp.eq.s32.totalorder %v1138_v12, 0 }
  0xfb   :  { %v300_v36 = vadd.f32 %v688_v29, %v992_v34  ;;  %v332_v37 = vadd.f32 %v712_v30, %v992_v34  ;;  %v1074_v38 = vmul.f32 %v1058_v28, %v1058_v28  ;;  %v1092_v52 = vmul.f32 %v1068_v35, %v1068_v35 }
  0xfc   :  { %v690_v39 = vpop.f32.mrf.mxu0  ;;  %v714_v40 = vpop.f32.mrf.mxu1 }
  0xfd   :  { %v1076_v41 = vmax.f32 %v300_v36, 0.0  ;;  %v691_v42 = vadd.f32 %v690_v39, %v689_v31  ;;  %v715_v43 = vadd.f32 %v714_v40, %v713_v32  ;;  %397 = vrot.lane.b32.xlu1 %v1066_v33, %s872_s0  ;;  %383 = vrot.lane.b32.xlu0 %v1074_v38, %s872_s0  ;;  %v1082_v44 = vmax.f32 %v332_v37, 0.0 }
  0xfe   :  { %v692_v46 = vpop.f32.mrf.mxu0  ;;  %v716_v47 = vpop.f32.mrf.mxu1 }
  0xff   :  { %v305_v48 = vadd.f32 %v691_v42, %v992_v34  ;;  %v337_v49 = vadd.f32 %v715_v43, %v992_v34  ;;  %v1088_v51 = vmul.f32 %v1076_v41, %v1076_v41  ;;  %v1102_v61 = vmul.f32 %v1082_v44, %v1082_v44 }
 0x100   :  { %v693_v54 = vpop.f32.mrf.mxu0  ;;  %v717_v55 = vpop.f32.mrf.mxu1 }
 0x101   :  { %v1094_v57 = vmax.f32 %v305_v48, 0.0  ;;  %v694_v58 = vadd.f32 %v693_v54, %v692_v46  ;;  %v718_v60 = vadd.f32 %v717_v55, %v716_v47  ;;  %385 = vrot.lane.b32.xlu1 %v1088_v51, %s872_s0  ;;  %399 = vrot.lane.b32.xlu0 %v1092_v52, %s872_s0  ;;  %v1104_v62 = vmax.f32 %v337_v49, 0.0 }
 0x103   :  { %v308_v63 = vadd.f32 %v694_v58, %v992_v34  ;;  %v340_v2 = vadd.f32 %v718_v60, %v992_v34  ;;  %v1110_v3 = vmul.f32 %v1094_v57, %v1094_v57  ;;  %v1126_v34 = vmul.f32 %v1104_v62, %v1104_v62 }
 0x105   :  { %v1112_v5 = vmax.f32 %v308_v63, 0.0  ;;  %401 = vrot.lane.b32.xlu1 %v1102_v61, %s872_s0  ;;  %387 = vrot.lane.b32.xlu0 %v1110_v3, %s872_s0  ;;  %v1118_v6 = vmax.f32 %v340_v2, 0.0 }
 0x107   :  { %v1122_v7 = vmul.f32 %v1112_v5, %v1112_v5  ;;  %v1134_v8 = vmul.f32 %v1118_v6, %v1118_v6 }
 0x109   :  { %389 = vrot.lane.b32.xlu1 %v1122_v7, %s872_s0  ;;  %403 = vrot.lane.b32.xlu0 %v1126_v34, %s872_s0 }
 0x10d   :  { %405 = vrot.lane.b32.xlu1 %v1134_v8, %s872_s0 }
 0x15f   :  { %v376_v14 = vpop.permute.xlu0 %375 }
 0x160   :  { %v410_v15 = vsel %vm409_vm0, 0.0, %v376_v14 }
 0x161   :  { %v426_v17 = vadd.f32 %v410_v15, %v1004_v53 }
 0x163   :  { %v442_v18 = vmul.f32 0.5, %v426_v17  ;;  %v394_v20 = vpop.permute.xlu1 %393  ;;  %v392_v21 = vpop.permute.xlu0 %391 }
 0x164   :  { %v419_v22 = vsel %vm409_vm0, 0.0, %v394_v20  ;;  %v418_v23 = vsel %vm409_vm0, 0.0, %v392_v21 }
 0x165   :  { %v458_v26 = vmul.f32 0.0001, %v442_v18  ;;  %v435_v27 = vadd.f32 %v419_v22, %v1016_v0  ;;  %v434_v29 = vadd.f32 %v418_v23, %v1020_v1 }
 0x167   :  { %v474_v30 = vadd.f32 2.0, %v458_v26  ;;  %v451_v31 = vmul.f32 0.5, %v435_v27  ;;  %v450_v32 = vmul.f32 0.5, %v434_v29  ;;  %v380_v36 = vpop.permute.xlu1 %379  ;;  %v378_v37 = vpop.permute.xlu0 %377 }
 0x168   :  { %v412_v53 = vsel %vm409_vm0, 0.0, %v380_v36  ;;  %v411_v39 = vsel %vm409_vm0, 0.0, %v378_v37 }
 0x169   :  { %776 = vlog2.f32 %v474_v30  ;;  %v467_v40 = vmul.f32 0.0001, %v451_v31  ;;  %v466_v42 = vmul.f32 0.0001, %v450_v32  ;;  %v428_v43 = vadd.f32 %v412_v53, %v1038_v13 }
 0x16a   :  { %v427_v0 = vadd.f32 %v411_v39, %v1030_v9 }
 0x16b   :  { %v483_v46 = vadd.f32 2.0, %v467_v40  ;;  %v482_v1 = vadd.f32 2.0, %v466_v42  ;;  %v444_v47 = vmul.f32 0.5, %v428_v43  ;;  %v382_v48 = vpop.permute.xlu1 %381  ;;  %v396_v49 = vpop.permute.xlu0 %395 }
 0x16c   :  { %v443_v54 = vmul.f32 0.5, %v427_v0  ;;  %v413_v55 = vsel %vm409_vm0, 0.0, %v382_v48  ;;  %v420_v58 = vsel %vm409_vm0, 0.0, %v396_v49 }
 0x16d   :  { %778 = vlog2.f32 %v483_v46  ;;  %v460_v60 = vmul.f32 0.0001, %v444_v47  ;;  %v429_v63 = vadd.f32 %v413_v55, %v1052_v24  ;;  %v436_v13 = vadd.f32 %v420_v58, %v1056_v25 }
 0x16e   :  { %780 = vlog2.f32 %v482_v1  ;;  %v459_v9 = vmul.f32 0.0001, %v443_v54 }
 0x16f   :  { %v476_v2 = vadd.f32 2.0, %v460_v60  ;;  %v445_v11 = vmul.f32 0.5, %v429_v63  ;;  %v452_v14 = vmul.f32 0.5, %v436_v13  ;;  %v398_v15 = vpop.permute.xlu1 %397  ;;  %v384_v17 = vpop.permute.xlu0 %383 }
 0x170   :  { %v475_v18 = vadd.f32 2.0, %v459_v9  ;;  %v421_v20 = vsel %vm409_vm0, 0.0, %v398_v15  ;;  %v414_v21 = vsel %vm409_vm0, 0.0, %v384_v17 }
 0x171   :  { %782 = vlog2.f32 %v476_v2  ;;  %v461_v22 = vmul.f32 0.0001, %v445_v11  ;;  %v468_v23 = vmul.f32 0.0001, %v452_v14  ;;  %v437_v24 = vadd.f32 %v421_v20, %v1066_v33 }
 0x172   :  { %784 = vlog2.f32 %v475_v18  ;;  %v430_v25 = vadd.f32 %v414_v21, %v1074_v38 }
 0x173   :  { %v477_v26 = vadd.f32 2.0, %v461_v22  ;;  %v484_v27 = vadd.f32 2.0, %v468_v23  ;;  %v453_v29 = vmul.f32 0.5, %v437_v24  ;;  %v386_v30 = vpop.permute.xlu1 %385  ;;  %v400_v31 = vpop.permute.xlu0 %399 }
 0x174   :  { %v446_v32 = vmul.f32 0.5, %v430_v25  ;;  %v415_v36 = vsel %vm409_vm0, 0.0, %v386_v30  ;;  %v422_v37 = vsel %vm409_vm0, 0.0, %v400_v31 }
 0x175   :  { %786 = vlog2.f32 %v477_v26  ;;  %v469_v53 = vmul.f32 0.0001, %v453_v29  ;;  %v431_v39 = vadd.f32 %v415_v36, %v1088_v51  ;;  %v438_v33 = vadd.f32 %v422_v37, %v1092_v52 }
 0x176   :  { %v777_v40 = vpop.eup %776  ;;  %788 = vlog2.f32 %v484_v27  ;;  %v462_v38 = vmul.f32 0.0001, %v446_v32 }
 0x177   :  { %v491_v42 = vmul.f32 0.6931472, %v777_v40  ;;  %v485_v43 = vadd.f32 2.0, %v469_v53  ;;  %v447_v0 = vmul.f32 0.5, %v431_v39  ;;  %v454_v46 = vmul.f32 0.5, %v438_v33  ;;  %v402_v1 = vpop.permute.xlu1 %401  ;;  %v388_v47 = vpop.permute.xlu0 %387 }
 0x178   :  { %v478_v48 = vadd.f32 2.0, %v462_v38  ;;  %v423_v49 = vsel %vm409_vm0, 0.0, %v402_v1  ;;  %v416_v54 = vsel %vm409_vm0, 0.0, %v388_v47 }
 0x179   :  { %v522_v55 = vmul.f32 0.75, %v491_v42  ;;  %790 = vlog2.f32 %v485_v43  ;;  %v463_v51 = vmul.f32 0.0001, %v447_v0  ;;  %v470_v52 = vmul.f32 0.0001, %v454_v46 }
 0x17a   :  { %v779_v58 = vpop.eup %778  ;;  %792 = vlog2.f32 %v478_v48  ;;  %v439_v60 = vadd.f32 %v423_v49, %v1102_v61  ;;  %v432_v63 = vadd.f32 %v416_v54, %v1110_v3 }
 0x17b   :  { %v781_v13 = vpop.eup %780  ;;  %v538_v9 = vmul.f32 1.442695, %v522_v55  ;;  %v509_v2 = vmul.f32 0.6931472, %v779_v58  ;;  %v479_v11 = vadd.f32 2.0, %v463_v51  ;;  %v486_v14 = vadd.f32 2.0, %v470_v52  ;;  %v390_v15 = vpop.permute.xlu1 %389 }
 0x17c   :  { %v404_v17 = vpop.permute.xlu0 %403  ;;  %v507_v18 = vmul.f32 0.6931472, %v781_v13  ;;  %v455_v20 = vmul.f32 0.5, %v439_v60  ;;  %v448_v21 = vmul.f32 0.5, %v432_v63  ;;  %v417_v22 = vsel %vm409_vm0, 0.0, %v390_v15 }
 0x17d   :  { %794 = vpow2.f32 %v538_v9  ;;  %v531_v23 = vmul.f32 0.75, %v509_v2  ;;  %v433_v24 = vadd.f32 %v417_v22, %v1122_v7  ;;  %v424_v61 = vsel %vm409_vm0, 0.0, %v404_v17 }
 0x17e   :  { %v783_v3 = vpop.eup %782  ;;  %v530_v25 = vmul.f32 0.75, %v507_v18  ;;  %796 = vlog2.f32 %v479_v11  ;;  %v471_v26 = vmul.f32 0.0001, %v455_v20  ;;  %v464_v27 = vmul.f32 0.0001, %v448_v21 }
 0x17f   :  { %v785_v29 = vpop.eup %784  ;;  %v556_v30 = vmul.f32 1.442695, %v531_v23  ;;  %v495_v31 = vmul.f32 0.6931472, %v783_v3  ;;  %798 = vlog2.f32 %v486_v14  ;;  %v449_v32 = vmul.f32 0.5, %v433_v24  ;;  %v406_v36 = vpop.permute.xlu1 %405 }
 0x180   :  { %v554_v37 = vmul.f32 1.442695, %v530_v25  ;;  %v493_v53 = vmul.f32 0.6931472, %v785_v29  ;;  %v487_v39 = vadd.f32 2.0, %v471_v26  ;;  %v480_v33 = vadd.f32 2.0, %v464_v27 }
 0x181   :  { %800 = vpow2.f32 %v556_v30  ;;  %v524_v7 = vmul.f32 0.75, %v495_v31  ;;  %v465_v40 = vmul.f32 0.0001, %v449_v32  ;;  %v440_v38 = vadd.f32 %v424_v61, %v1126_v34 }
 0x182   :  { %v787_v42 = vpop.eup %786  ;;  %802 = vpow2.f32 %v554_v37  ;;  %v523_v43 = vmul.f32 0.75, %v493_v53  ;;  %v425_v0 = vsel %vm409_vm0, 0.0, %v406_v36 }
 0x183   :  { %v789_v46 = vpop.eup %788  ;;  %v542_v1 = vmul.f32 1.442695, %v524_v7  ;;  %v497_v47 = vmul.f32 0.6931472, %v787_v42  ;;  %804 = vlog2.f32 %v487_v39  ;;  %v481_v48 = vadd.f32 2.0, %v465_v40 }
 0x184   :  { %v540_v49 = vmul.f32 1.442695, %v523_v43  ;;  %v511_v54 = vmul.f32 0.6931472, %v789_v46  ;;  %806 = vlog2.f32 %v480_v33  ;;  %v456_v55 = vmul.f32 0.5, %v440_v38 }
 0x185   :  { %808 = vpow2.f32 %v542_v1  ;;  %v525_v51 = vmul.f32 0.75, %v497_v47  ;;  %v441_v52 = vadd.f32 %v425_v0, %v1134_v8 }
 0x186   :  { %v791_v34 = vpop.eup %790  ;;  %810 = vpow2.f32 %v540_v49  ;;  %v532_v58 = vmul.f32 0.75, %v511_v54  ;;  %v472_v60 = vmul.f32 0.0001, %v456_v55 }
 0x187   :  { %v793_v63 = vpop.eup %792  ;;  %v544_v12 = vmul.f32 1.442695, %v525_v51  ;;  %v513_v13 = vmul.f32 0.6931472, %v791_v34  ;;  %812 = vlog2.f32 %v481_v48  ;;  %v457_v9 = vmul.f32 0.5, %v441_v52 }
 0x188   :  { %v558_v2 = vmul.f32 1.442695, %v532_v58  ;;  %v499_v11 = vmul.f32 0.6931472, %v793_v63  ;;  %v488_v14 = vadd.f32 2.0, %v472_v60 }
 0x189   :  { %814 = vpow2.f32 %v544_v12  ;;  %v533_v15 = vmul.f32 0.75, %v513_v13  ;;  %v473_v17 = vmul.f32 0.0001, %v457_v9 }
 0x18a   :  { %v795_v18 = vpop.eup %794  ;;  %816 = vpow2.f32 %v558_v2  ;;  %v526_v20 = vmul.f32 0.75, %v499_v11 }
 0x18b   :  { %v797_v21 = vpop.eup %796  ;;  %818 = vrcp.f32 %v795_v18  ;;  %v560_v8 = vmul.f32 1.442695, %v533_v15  ;;  %v489_v3 = vadd.f32 2.0, %v473_v17 }
 0x18c   :  { %v799_v22 = vpop.eup %798  ;;  %v546_v23 = vmul.f32 1.442695, %v526_v20  ;;  %v501_v24 = vmul.f32 0.6931472, %v797_v21  ;;  %820 = vlog2.f32 %v488_v14 }
 0x18d   :  { %822 = vpow2.f32 %v560_v8  ;;  %v515_v61 = vmul.f32 0.6931472, %v799_v22 }
 0x18e   :  { %v801_v25 = vpop.eup %800  ;;  %824 = vpow2.f32 %v546_v23  ;;  %v527_v26 = vmul.f32 0.75, %v501_v24 }
 0x18f   :  { %v803_v27 = vpop.eup %802  ;;  %826 = vrcp.f32 %v801_v25  ;;  %v534_v29 = vmul.f32 0.75, %v515_v61 }
 0x190   :  { %v805_v30 = vpop.eup %804  ;;  %828 = vrcp.f32 %v803_v27  ;;  %v548_v31 = vmul.f32 1.442695, %v527_v26 }
 0x191   :  { %v807_v32 = vpop.eup %806  ;;  %v562_v36 = vmul.f32 1.442695, %v534_v29  ;;  %v517_v37 = vmul.f32 0.6931472, %v805_v30  ;;  %830 = vlog2.f32 %v489_v3 }
 0x192   :  { %v809_v53 = vpop.eup %808  ;;  %832 = vpow2.f32 %v548_v31  ;;  %v503_v39 = vmul.f32 0.6931472, %v807_v32 }
 0x193   :  { %v811_v33 = vpop.eup %810  ;;  %834 = vrcp.f32 %v809_v53  ;;  %v535_v7 = vmul.f32 0.75, %v517_v37 }
 0x194   :  { %v813_v40 = vpop.eup %812  ;;  %836 = vrcp.f32 %v811_v33  ;;  %v528_v38 = vmul.f32 0.75, %v503_v39 }
 0x195   :  { %838 = vpow2.f32 %v562_v36  ;;  %v564_v42 = vmul.f32 1.442695, %v535_v7  ;;  %v505_v43 = vmul.f32 0.6931472, %v813_v40 }
 0x196   :  { %v815_v0 = vpop.eup %814  ;;  %v550_v46 = vmul.f32 1.442695, %v528_v38 }
 0x197   :  { %v817_v1 = vpop.eup %816  ;;  %840 = vrcp.f32 %v815_v0  ;;  %v529_v47 = vmul.f32 0.75, %v505_v43 }
 0x198   :  { %v819_v48 = vpop.eup %818  ;;  %842 = vrcp.f32 %v817_v1 }
 0x199   :  { %v821_v49 = vpop.eup %820  ;;  %v571_v54 = vmul.f32 %v819_v48, %v996_v45  ;;  %844 = vpow2.f32 %v564_v42  ;;  %v552_v55 = vmul.f32 1.442695, %v529_v47 }
 0x19a   :  { %v823_v51 = vpop.eup %822  ;;  %846 = vpow2.f32 %v550_v46  ;;  %v519_v52 = vmul.f32 0.6931472, %v821_v49 }
 0x19b   :  { %v825_v34 = vpop.eup %824  ;;  %602 = vst [vmem:[%s1256_s3] sm:$0xff] %v571_v54  ;;  %848 = vrcp.f32 %v823_v51 }
 0x19c   :  { %v827_v58 = vpop.eup %826  ;;  %850 = vrcp.f32 %v825_v34  ;;  %v536_v60 = vmul.f32 0.75, %v519_v52 }
 0x19d   :  { %v829_v63 = vpop.eup %828  ;;  %v589_v12 = vmul.f32 %v827_v58, %v1006_v56  ;;  %852 = vpow2.f32 %v552_v55 }
 0x19e   :  { %v831_v13 = vpop.eup %830  ;;  %v587_v45 = vmul.f32 %v829_v63, %v998_v50  ;;  %v566_v9 = vmul.f32 1.442695, %v536_v60 }
 0x19f   :  { %v833_v2 = vpop.eup %832  ;;  %611 = vst [vmem:[%s1256_s3 + $0x48] sm:$0xff] %v589_v12  ;;  %v521_v11 = vmul.f32 0.6931472, %v831_v13 }
 0x1a0   :  { %v835_v14 = vpop.eup %834  ;;  %610 = vst [vmem:[%s1256_s3 + $0x40] sm:$0xff] %v587_v45  ;;  %854 = vrcp.f32 %v833_v2 }
 0x1a1   :  { %v837_v15 = vpop.eup %836  ;;  %v575_v56 = vmul.f32 %v835_v14, %v1022_v4  ;;  %856 = vpow2.f32 %v566_v9  ;;  %v537_v17 = vmul.f32 0.75, %v521_v11 }
 0x1a2   :  { %v839_v18 = vpop.eup %838  ;;  %v573_v50 = vmul.f32 %v837_v15, %v1010_v59 }
 0x1a3   :  { %604 = vst [vmem:[%s1256_s3 + $0x10] sm:$0xff] %v575_v56  ;;  %858 = vrcp.f32 %v839_v18  ;;  %v568_v20 = vmul.f32 1.442695, %v537_v17 }
 0x1a4   :  { %v841_v21 = vpop.eup %840  ;;  %603 = vst [vmem:[%s1256_s3 + $0x8] sm:$0xff] %v573_v50 }
 0x1a5   :  { %v843_v8 = vpop.eup %842  ;;  %v577_v22 = vmul.f32 %v841_v21, %v1040_v16  ;;  %860 = vpow2.f32 %v568_v20 }
 0x1a6   :  { %v845_v4 = vpop.eup %844  ;;  %v591_v23 = vmul.f32 %v843_v8, %v1032_v10 }
 0x1a7   :  { %v847_v24 = vpop.eup %846  ;;  %605 = vst [vmem:[%s1256_s3 + $0x18] sm:$0xff] %v577_v22  ;;  %862 = vrcp.f32 %v845_v4 }
 0x1a8   :  { %v849_v59 = vpop.eup %848  ;;  %612 = vst [vmem:[%s1256_s3 + $0x50] sm:$0xff] %v591_v23  ;;  %864 = vrcp.f32 %v847_v24 }
 0x1a9   :  { %v851_v61 = vpop.eup %850  ;;  %v593_v3 = vmul.f32 %v849_v59, %v1046_v19 }
 0x1aa   :  { %v853_v16 = vpop.eup %852  ;;  %v579_v25 = vmul.f32 %v851_v61, %v1058_v28 }
 0x1ab   :  { %613 = vst [vmem:[%s1256_s3 + $0x58] sm:$0xff] %v593_v3  ;;  %866 = vrcp.f32 %v853_v16 }
 0x1ac   :  { %606 = vst [vmem:[%s1256_s3 + $0x20] sm:$0xff] %v579_v25 }
 0x1ad   :  { %v855_v10 = vpop.eup %854 }
 0x1ae   :  { %v857_v26 = vpop.eup %856  ;;  %v581_v27 = vmul.f32 %v855_v10, %v1076_v41 }
 0x1af   :  { %868 = vrcp.f32 %v857_v26 }
 0x1b0   :  { %v859_v29 = vpop.eup %858  ;;  %607 = vst [vmem:[%s1256_s3 + $0x28] sm:$0xff] %v581_v27 }
 0x1b1   :  { %v595_v19 = vmul.f32 %v859_v29, %v1068_v35 }
 0x1b2   :  { %v861_v28 = vpop.eup %860 }
 0x1b3   :  { %614 = vst [vmem:[%s1256_s3 + $0x60] sm:$0xff] %v595_v19  ;;  %870 = vrcp.f32 %v861_v28 }
 0x1b4   :  { %v863_v30 = vpop.eup %862 }
 0x1b5   :  { %v865_v31 = vpop.eup %864  ;;  %v597_v32 = vmul.f32 %v863_v30, %v1082_v44 }
 0x1b6   :  { %v583_v41 = vmul.f32 %v865_v31, %v1094_v57 }
 0x1b7   :  { %615 = vst [vmem:[%s1256_s3 + $0x68] sm:$0xff] %v597_v32 }
 0x1b8   :  { %v867_v36 = vpop.eup %866  ;;  %608 = vst [vmem:[%s1256_s3 + $0x30] sm:$0xff] %v583_v41 }
 0x1b9   :  { %v585_v35 = vmul.f32 %v867_v36, %v1112_v5 }
 0x1bb   :  { %609 = vst [vmem:[%s1256_s3 + $0x38] sm:$0xff] %v585_v35 }
 0x1bc   :  { %v869_v37 = vpop.eup %868 }
 0x1bd   :  { %v599_v44 = vmul.f32 %v869_v37, %v1104_v62 }
 0x1bf   :  { %616 = vst [vmem:[%s1256_s3 + $0x70] sm:$0xff] %v599_v44 }
 0x1c0   :  { %v871_v57 = vpop.eup %870 }
 0x1c1   :  { %v601_v53 = vmul.f32 %v871_v57, %v1118_v6 }
 0x1c3   :  { %617 = vst [vmem:[%s1256_s3 + $0x78] sm:$0xff] %v601_v53 }

// kernel: imagenet_forward.10
= control target key start
LH: loop header
LB: loop body
LE: loop exit
PB: predicated region body
PF: predicated region fallthrough
CT: control target
= control target key end

     0   :  { %s610_s1 = inlined_call_operand.vmem [shape: bf16[384,128], index: 1, kind: input, shape index: {}]   ;;  %s611_s0 = inlined_call_operand.vmem [shape: bf16[32,384], index: 0, kind: input, shape index: {}]   ;;  %s612_s2 = inlined_call_operand.vmem [shape: f32[1,128], index: 2, kind: input, shape index: {}]   ;;  %s613_s3 = inlined_call_operand.vmem [shape: f32[32,128], index: 3, kind: output, shape index: {}]  }
   0x1   :  { %v453_v0 = vld [vmem:[%s610_s1 + $0x78] sm:$0xff]   ;;  %v455_v2 = vld [vmem:[%s610_s1 + $0x70] sm:$0xff]   ;;  %v458_v5 = vld [vmem:[%s610_s1 + $0x68] sm:$0xff]  }
   0x2   :  { %v454_v1 = vld [vmem:[%s610_s1 + $0x38] sm:$0xff]   ;;  %395 = vmatprep.subr.bf16.mxu0 %v453_v0  ;;  %v457_v4 = vld [vmem:[%s610_s1 + $0x30] sm:$0xff]   ;;  %v460_v7 = vld [vmem:[%s610_s1 + $0x28] sm:$0xff]  }
   0x3   :  { %396 = vmatpush3.bf16.msra.mxu0 %v454_v1  ;;  %v456_v3 = vld [vmem:[%s610_s1 + $0xb8] sm:$0xff]   ;;  %v459_v6 = vld [vmem:[%s610_s1 + $0xb0] sm:$0xff]   ;;  %v461_v8 = vld [vmem:[%s610_s1 + $0x60] sm:$0xff]  }
   0x4   :  { %397 = vmatprep.subr.bf16.mxu0 %v455_v2  ;;  %433 = vmatprep.subr.bf16.mxu1 %v456_v3  ;;  %v462_v9 = vld [vmem:[%s610_s1 + $0xa8] sm:$0xff]   ;;  %v463_v10 = vld [vmem:[%s610_s1 + $0x20] sm:$0xff]   ;;  %v464_v11 = vld [vmem:[%s610_s1 + $0x58] sm:$0xff]  }
   0x5   :  { %434 = vmatpush3.bf16.msra.mxu1 %v456_v3  ;;  %v465_v12 = vld [vmem:[%s610_s1 + $0xa0] sm:$0xff]   ;;  %v466_v13 = vld [vmem:[%s610_s1 + $0x18] sm:$0xff]   ;;  %v467_v15 = vld [vmem:[%s610_s1 + $0x50] sm:$0xff]  }
   0x6   :  { %435 = vmatprep.subr.bf16.mxu1 %v459_v6  ;;  %v468_v14 = vld [vmem:[%s610_s1 + $0x98] sm:$0xff]   ;;  %v469_v16 = vld [vmem:[%s610_s1 + $0x10] sm:$0xff]   ;;  %v470_v18 = vld [vmem:[%s610_s1 + $0x48] sm:$0xff]  }
   0x7   :  { %398 = vmatpush3.bf16.msra.mxu0 %v457_v4  ;;  %v471_v17 = vld [vmem:[%s610_s1 + $0x90] sm:$0xff]   ;;  %v472_v19 = vld [vmem:[%s610_s1 + $0x8] sm:$0xff]   ;;  %v473_v20 = vld [vmem:[%s610_s1 + $0x40] sm:$0xff]  }
   0x8   :  { %399 = vmatprep.subr.bf16.mxu0 %v458_v5  ;;  %v474_v21 = vld [vmem:[%s610_s1 + $0x88] sm:$0xff]   ;;  %v478_v22 = vld [vmem:[%s611_s0 + $0x4] ss:$12 sps:$4 sm:$0xff]   ;;  %v364_v32 = vld [vmem:[%s612_s2] ss:$0 sm:$0xff] }
   0x9   :  { %436 = vmatpush3.bf16.msra.mxu1 %v459_v6  ;;  %v475_v23 = vld [vmem:[%s610_s1] sm:$0xff]   ;;  %286 = vmatprep.mubr.bf16.mxu0 %v478_v22  ;;  %v480_v24 = vld [vmem:[%s611_s0 + $0x8] ss:$12 sps:$4 sm:$0xff]  }
   0xa   :  { %437 = vmatprep.subr.bf16.mxu1 %v462_v9  ;;  %v479_v25 = vld [vmem:[%s610_s1 + $0x80] sm:$0xff]   ;;  %449 = vmatprep.mubr.bf16.mxu1 %v480_v24  ;;  %v482_v27 = vld [vmem:[%s611_s0 + $0x1c] ss:$12 sps:$4 sm:$0xff]  }
   0xb   :  { %400 = vmatpush3.bf16.msra.mxu0 %v460_v7  ;;  %v476_v26 = vld [vmem:[%s611_s0] ss:$12 sps:$4 sm:$0xff]   ;;  %v484_v29 = vld [vmem:[%s611_s0 + $0x18] ss:$12 sps:$4 sm:$0xff]  }
   0xc   :  { %401 = vmatprep.subr.bf16.mxu0 %v461_v8  ;;  %v481_v28 = vld [vmem:[%s611_s0 + $0x20] ss:$12 sps:$4 sm:$0xff]  }
   0xd   :  { %438 = vmatpush3.bf16.msra.mxu1 %v462_v9 }
   0xe   :  { %439 = vmatprep.subr.bf16.mxu1 %v465_v12 }
   0xf   :  { %402 = vmatpush3.bf16.msra.mxu0 %v463_v10 }
  0x10   :  { %403 = vmatprep.subr.bf16.mxu0 %v464_v11 }
  0x11   :  { %440 = vmatpush3.bf16.msra.mxu1 %v465_v12 }
  0x12   :  { %441 = vmatprep.subr.bf16.mxu1 %v468_v14 }
  0x13   :  { %404 = vmatpush3.bf16.msra.mxu0 %v466_v13 }
  0x14   :  { %405 = vmatprep.subr.bf16.mxu0 %v467_v15 }
  0x15   :  { %442 = vmatpush3.bf16.msra.mxu1 %v468_v14 }
  0x16   :  { %443 = vmatprep.subr.bf16.mxu1 %v471_v17 }
  0x17   :  { %406 = vmatpush3.bf16.msra.mxu0 %v469_v16 }
  0x18   :  { %407 = vmatprep.subr.bf16.mxu0 %v470_v18 }
  0x19   :  { %444 = vmatpush3.bf16.msra.mxu1 %v471_v17 }
  0x1a   :  { %445 = vmatprep.subr.bf16.mxu1 %v474_v21 }
  0x1b   :  { %408 = vmatpush3.bf16.msra.mxu0 %v472_v19 }
  0x1c   :  { %409 = vmatprep.subr.bf16.mxu0 %v473_v20 }
  0x1d   :  { %446 = vmatpush3.bf16.msra.mxu1 %v474_v21 }
  0x1e   :  { %447 = vmatprep.subr.bf16.mxu1 %v479_v25 }
  0x1f   :  { %410 = vmatpush3.bf16.msra.mxu0 %v475_v23 }
  0x21   :  { %448 = vmatpush3.bf16.msra.mxu1 %v479_v25 }
  0x22   :  { %287 = vmatmul.mubr.bf16.vlgmr.msra.gmra.mxu0 %v476_v26 }
  0x23   :  { %294 = vmatprep.mubr.bf16.mxu0 %v482_v27 }
  0x24   :  { %450 = vmatmul.mubr.bf16.vlgmr.msra.gmra.mxu1 %v481_v28 }
  0x2a   :  { %295 = vmatmul.mubr.bf16.gmra.mxu0 %v484_v29 }
  0xe2   :  { %v411_v30 = vpop.f32.mrf.mxu0 }
  0xe4   :  { %v412_v31 = vpop.f32.mrf.mxu0  ;;  %v451_v34 = vpop.f32.mrf.mxu1 }
  0xe5   :  { %v413_v33 = vadd.f32 %v412_v31, %v411_v30 }
  0xe6   :  { %v414_v35 = vpop.f32.mrf.mxu0  ;;  %v337_v37 = vpop.f32.mrf.mxu1 }
  0xe7   :  { %v289_v36 = vadd.f32 %v413_v33, %v364_v32 }
  0xe8   :  { %v415_v38 = vpop.f32.mrf.mxu0  ;;  %v452_v41 = vpop.f32.mrf.mxu1 }
  0xe9   :  { %v416_v39 = vadd.f32 %v415_v38, %v414_v35  ;;  %v338_v40 = vadd.f32 %v337_v37, %v289_v36 }
  0xea   :  { %v417_v42 = vpop.f32.mrf.mxu0  ;;  %v340_v45 = vpop.f32.mrf.mxu1 }
  0xeb   :  { %v352_v43 = vmax.f32 %v338_v40, 0.0  ;;  %v292_v44 = vadd.f32 %v416_v39, %v364_v32 }
  0xec   :  { %v418_v46 = vpop.f32.mrf.mxu0 }
  0xed   :  { %356 = vst [vmem:[%s613_s3] sm:$0xff] %v352_v43  ;;  %v419_v47 = vadd.f32 %v418_v46, %v417_v42  ;;  %v341_v48 = vadd.f32 %v340_v45, %v292_v44 }
  0xee   :  { %v420_v49 = vpop.f32.mrf.mxu0 }
  0xef   :  { %v297_v50 = vadd.f32 %v419_v47, %v364_v32  ;;  %v353_v51 = vmax.f32 %v341_v48, 0.0 }
  0xf0   :  { %v421_v52 = vpop.f32.mrf.mxu0 }
  0xf1   :  { %v346_v53 = vadd.f32 %v451_v34, %v297_v50  ;;  %357 = vst [vmem:[%s613_s3 + $0x8] sm:$0xff] %v353_v51  ;;  %v422_v54 = vadd.f32 %v421_v52, %v420_v49 }
  0xf3   :  { %v354_v55 = vmax.f32 %v346_v53, 0.0  ;;  %v300_v56 = vadd.f32 %v422_v54, %v364_v32 }
  0xf5   :  { %358 = vst [vmem:[%s613_s3 + $0x10] sm:$0xff] %v354_v55  ;;  %v349_v57 = vadd.f32 %v452_v41, %v300_v56 }
  0xf7   :  { %v355_v58 = vmax.f32 %v349_v57, 0.0 }
  0xf9   :  { %359 = vst [vmem:[%s613_s3 + $0x18] sm:$0xff] %v355_v58 }

// kernel: imagenet_forward.13
= control target key start
LH: loop header
LB: loop body
LE: loop exit
PB: predicated region body
PF: predicated region fallthrough
CT: control target
= control target key end

     0   :  { %v856_v0 = vmov 0.0   ;;  %vm857_vm0 = vmmov 0   ;;  %s1133_s1 = inlined_call_operand.vmem [shape: bf16[128,128], index: 1, kind: input, shape index: {}]   ;;  %s1134_s4 = inlined_call_operand.vmem [shape: bf16[128,128], index: 4, kind: input, shape index: {}]   ;;  %s1135_s0 = inlined_call_operand.vmem [shape: bf16[8,128], index: 0, kind: input, shape index: {}]   ;;  %s1136_s7 = inlined_call_operand.vmem [shape: bf16[128,128], index: 7, kind: input, shape index: {}]   ;;  %s1137_s2 = inlined_call_operand.vmem [shape: f32[1,128], index: 2, kind: input, shape index: {}]   ;;  %s1138_s3 = inlined_call_operand.vmem [shape: f32[8,128], index: 3, kind: input, shape index: {}]   ;;  %s1139_s9 = inlined_call_operand.vmem [shape: bf16[128,128], index: 9, kind: input, shape index: {}]   ;;  %s1140_s5 = inlined_call_operand.vmem [shape: f32[1,128], index: 5, kind: input, shape index: {}]   ;;  %s1141_s6 = inlined_call_operand.vmem [shape: f32[8,128], index: 6, kind: input, shape index: {}]   ;;  %s1142_s11 = inlined_call_operand.vmem [shape: bf16[128,128], index: 11, kind: input, shape index: {}]   ;;  %s1143_s8 = inlined_call_operand.vmem [shape: f32[1,128], index: 8, kind: input, shape index: {}]   ;;  %s1144_s10 = inlined_call_operand.vmem [shape: f32[1,128], index: 10, kind: input, shape index: {}]   ;;  %s1145_s13 = inlined_call_operand.vmem [shape: f32[8,128], index: 13, kind: output, shape index: {0}]   ;;  %s1146_s12 = inlined_call_operand.vmem [shape: f32[1,128], index: 12, kind: input, shape index: {}]   ;;  %s1147_s14 = inlined_call_operand.vmem [shape: f32[8,128], index: 14, kind: output, shape index: {1}]  }
   0x1   :  { %714 = vmatprep.subr.bf16.mxu0 %v856_v0  ;;  %v816_v1 = vld [vmem:[%s1133_s1 + $0x38] sm:$0xff]   ;;  %730 = vmatprep.mubr.msk.bf16.mxu0 %vm857_vm0, %v856_v0  ;;  %v817_v2 = vld [vmem:[%s1133_s1 + $0x30] sm:$0xff]   ;;  %v818_v3 = vld [vmem:[%s1133_s1 + $0x28] sm:$0xff]  }
   0x2   :  { %734 = vmatprep.subr.bf16.mxu1 %v856_v0  ;;  %750 = vmatprep.mubr.msk.bf16.mxu1 %vm857_vm0, %v856_v0  ;;  %v824_v4 = vld [vmem:[%s1134_s4 + $0x38] sm:$0xff]   ;;  %v819_v5 = vld [vmem:[%s1133_s1 + $0x20] sm:$0xff]   ;;  %v825_v6 = vld [vmem:[%s1134_s4 + $0x30] sm:$0xff]  }
   0x3   :  { %715 = vmatpush3.bf16.msra.mxu0 %v816_v1  ;;  %735 = vmatpush3.bf16.msra.mxu1 %v824_v4  ;;  %v820_v7 = vld [vmem:[%s1133_s1 + $0x18] sm:$0xff]   ;;  %v826_v8 = vld [vmem:[%s1134_s4 + $0x28] sm:$0xff]   ;;  %v821_v9 = vld [vmem:[%s1133_s1 + $0x10] sm:$0xff]  }
   0x4   :  { %716 = vmatprep.subr.bf16.mxu0 %v856_v0  ;;  %736 = vmatprep.subr.bf16.mxu1 %v856_v0  ;;  %v827_v10 = vld [vmem:[%s1134_s4 + $0x20] sm:$0xff]   ;;  %v822_v11 = vld [vmem:[%s1133_s1 + $0x8] sm:$0xff]   ;;  %v828_v12 = vld [vmem:[%s1134_s4 + $0x18] sm:$0xff]  }
   0x5   :  { %v823_v13 = vld [vmem:[%s1133_s1] sm:$0xff]   ;;  %v829_v14 = vld [vmem:[%s1134_s4 + $0x10] sm:$0xff]   ;;  %v830_v16 = vld [vmem:[%s1134_s4 + $0x8] sm:$0xff]  }
   0x6   :  { %v47_v15 = vld [vmem:[%s1135_s0] sm:$0xf]  ;;  %v832_v18 = vld [vmem:[%s1136_s7 + $0x38] sm:$0xff]   ;;  %v833_v19 = vld [vmem:[%s1136_s7 + $0x30] sm:$0xff]  }
   0x7   :  { %717 = vmatpush3.bf16.msra.mxu0 %v817_v2  ;;  %737 = vmatpush3.bf16.msra.mxu1 %v825_v6  ;;  %v831_v17 = vld [vmem:[%s1134_s4] sm:$0xff]   ;;  %v834_v20 = vld [vmem:[%s1136_s7 + $0x28] sm:$0xff]   ;;  %v836_v22 = vld [vmem:[%s1136_s7 + $0x18] sm:$0xff]  }
   0x8   :  { %718 = vmatprep.subr.bf16.mxu0 %v856_v0  ;;  %738 = vmatprep.subr.bf16.mxu1 %v856_v0  ;;  %v835_v21 = vld [vmem:[%s1136_s7 + $0x20] sm:$0xff]   ;;  %v837_v23 = vld [vmem:[%s1136_s7 + $0x10] sm:$0xff]   ;;  %v838_v34 = vld [vmem:[%s1136_s7 + $0x8] sm:$0xff]  }
   0x9   :  { %v624_v24 = vld [vmem:[%s1137_s2] ss:$0 sm:$0xff]  ;;  %v840_v36 = vld [vmem:[%s1139_s9 + $0x38] sm:$0xff]   ;;  %v841_v37 = vld [vmem:[%s1139_s9 + $0x30] sm:$0xff]  }
   0xa   :  { %v160_v27 = vld [vmem:[%s1138_s3] sm:$0xff]  ;;  %v842_v38 = vld [vmem:[%s1139_s9 + $0x28] sm:$0xff]   ;;  %v844_v40 = vld [vmem:[%s1139_s9 + $0x18] sm:$0xff]  }
   0xb   :  { %719 = vmatpush3.bf16.msra.mxu0 %v818_v3  ;;  %739 = vmatpush3.bf16.msra.mxu1 %v826_v8  ;;  %v839_v35 = vld [vmem:[%s1136_s7] sm:$0xff]   ;;  %v845_v41 = vld [vmem:[%s1139_s9 + $0x10] sm:$0xff]   ;;  %v846_v52 = vld [vmem:[%s1139_s9 + $0x8] sm:$0xff]  }
   0xc   :  { %720 = vmatprep.subr.bf16.mxu0 %v856_v0  ;;  %740 = vmatprep.subr.bf16.mxu1 %v856_v0  ;;  %v843_v39 = vld [vmem:[%s1139_s9 + $0x20] sm:$0xff]   ;;  %v848_v54 = vld [vmem:[%s1142_s11 + $0x38] sm:$0xff]   ;;  %v849_v55 = vld [vmem:[%s1142_s11 + $0x30] sm:$0xff]  }
   0xd   :  { %v633_v42 = vld [vmem:[%s1140_s5] ss:$0 sm:$0xff]  ;;  %v850_v56 = vld [vmem:[%s1142_s11 + $0x28] sm:$0xff]   ;;  %v852_v58 = vld [vmem:[%s1142_s11 + $0x18] sm:$0xff]  }
   0xe   :  { %v275_v45 = vld [vmem:[%s1141_s6] sm:$0xff]  ;;  %v853_v59 = vld [vmem:[%s1142_s11 + $0x10] sm:$0xff]   ;;  %v854_v60 = vld [vmem:[%s1142_s11 + $0x8] sm:$0xff]  }
   0xf   :  { %721 = vmatpush3.bf16.msra.mxu0 %v819_v5  ;;  %741 = vmatpush3.bf16.msra.mxu1 %v827_v10  ;;  %v847_v53 = vld [vmem:[%s1139_s9] sm:$0xff]  }
  0x10   :  { %722 = vmatprep.subr.bf16.mxu0 %v856_v0  ;;  %742 = vmatprep.subr.bf16.mxu1 %v856_v0  ;;  %v851_v57 = vld [vmem:[%s1142_s11 + $0x20] sm:$0xff]  }
  0x11   :  { %v642_v61 = vld [vmem:[%s1143_s8] ss:$0 sm:$0xff] }
  0x12   :  { %v855_v6 = vld [vmem:[%s1142_s11] sm:$0xff]  }
  0x13   :  { %723 = vmatpush3.bf16.msra.mxu0 %v820_v7  ;;  %743 = vmatpush3.bf16.msra.mxu1 %v828_v12 }
  0x14   :  { %724 = vmatprep.subr.bf16.mxu0 %v856_v0  ;;  %744 = vmatprep.subr.bf16.mxu1 %v856_v0 }
  0x17   :  { %725 = vmatpush3.bf16.msra.mxu0 %v821_v9  ;;  %745 = vmatpush3.bf16.msra.mxu1 %v829_v14 }
  0x18   :  { %726 = vmatprep.subr.bf16.mxu0 %v856_v0  ;;  %746 = vmatprep.subr.bf16.mxu1 %v856_v0 }
  0x1b   :  { %727 = vmatpush3.bf16.msra.mxu0 %v822_v11  ;;  %747 = vmatpush3.bf16.msra.mxu1 %v830_v16 }
  0x1c   :  { %728 = vmatprep.subr.bf16.mxu0 %v856_v0  ;;  %748 = vmatprep.subr.bf16.mxu1 %v856_v0 }
  0x1f   :  { %729 = vmatpush3.bf16.msra.mxu0 %v823_v13  ;;  %749 = vmatpush3.bf16.msra.mxu1 %v831_v17  ;;  %v660_v13 = vld [vmem:[%s1146_s12] ss:$0 sm:$0xff] }
  0x20   :  { %754 = vmatprep.subr.bf16.mxu0 %v856_v0  ;;  %774 = vmatprep.subr.bf16.mxu1 %v856_v0 }
  0x22   :  { %731 = vmatmul.mubr.bf16.vlgmr.msra.gmra.mxu0 %v47_v15 }
  0x23   :  { %770 = vmatprep.mubr.msk.bf16.mxu0 %vm857_vm0, %v856_v0  ;;  %755 = vmatpush3.bf16.msra.mxu0 %v832_v18 }
  0x24   :  { %756 = vmatprep.subr.bf16.mxu0 %v856_v0 }
  0x27   :  { %757 = vmatpush3.bf16.msra.mxu0 %v833_v19 }
  0x28   :  { %758 = vmatprep.subr.bf16.mxu0 %v856_v0 }
  0x2b   :  { %759 = vmatpush3.bf16.msra.mxu0 %v834_v20 }
  0x2c   :  { %760 = vmatprep.subr.bf16.mxu0 %v856_v0 }
  0x2f   :  { %761 = vmatpush3.bf16.msra.mxu0 %v835_v21 }
  0x30   :  { %762 = vmatprep.subr.bf16.mxu0 %v856_v0 }
  0x33   :  { %763 = vmatpush3.bf16.msra.mxu0 %v836_v22 }
  0x34   :  { %764 = vmatprep.subr.bf16.mxu0 %v856_v0 }
  0x37   :  { %765 = vmatpush3.bf16.msra.mxu0 %v837_v23 }
  0x38   :  { %766 = vmatprep.subr.bf16.mxu0 %v856_v0 }
  0x3b   :  { %767 = vmatpush3.bf16.msra.mxu0 %v838_v34 }
  0x3c   :  { %768 = vmatprep.subr.bf16.mxu0 %v856_v0 }
  0x3f   :  { %769 = vmatpush3.bf16.msra.mxu0 %v839_v35 }
  0x40   :  { %794 = vmatprep.subr.bf16.mxu0 %v856_v0 }
  0xe2   :  { %v153_v25 = vpop.f32.mrf.mxu0 }
  0xe3   :  { %v154_v26 = vadd.f32 %v624_v24, %v153_v25 }
  0xe4   :  { %v732_v28 = vpop.f32.mrf.mxu0 }
  0xe5   :  { %v159_v29 = vmax.f32 %v154_v26, 0.0 }
  0xe6   :  { %v156_v30 = vpop.f32.mrf.mxu0 }
  0xe7   :  { %v161_v31 = vmul.f32 %v160_v27, %v159_v29 }
  0xe8   :  { %v733_v32 = vpop.f32.mrf.mxu0 }
  0xe9   :  { %v162_v33 = vpack.c.bf16 %v161_v31, %v161_v31 }
  0xeb   :  { %751 = vmatmul.mubr.bf16.vlgmr.msra.gmra.mxu1 %v162_v33 }
  0xec   :  { %790 = vmatprep.mubr.msk.bf16.mxu1 %vm857_vm0, %v856_v0  ;;  %775 = vmatpush3.bf16.msra.mxu1 %v840_v36 }
  0xed   :  { %776 = vmatprep.subr.bf16.mxu1 %v856_v0 }
  0xf0   :  { %777 = vmatpush3.bf16.msra.mxu1 %v841_v37 }
  0xf1   :  { %778 = vmatprep.subr.bf16.mxu1 %v856_v0 }
  0xf4   :  { %779 = vmatpush3.bf16.msra.mxu1 %v842_v38 }
  0xf5   :  { %780 = vmatprep.subr.bf16.mxu1 %v856_v0 }
  0xf8   :  { %781 = vmatpush3.bf16.msra.mxu1 %v843_v39 }
  0xf9   :  { %782 = vmatprep.subr.bf16.mxu1 %v856_v0 }
  0xfc   :  { %783 = vmatpush3.bf16.msra.mxu1 %v844_v40 }
  0xfd   :  { %784 = vmatprep.subr.bf16.mxu1 %v856_v0 }
 0x100   :  { %785 = vmatpush3.bf16.msra.mxu1 %v845_v41 }
 0x101   :  { %786 = vmatprep.subr.bf16.mxu1 %v856_v0 }
 0x104   :  { %787 = vmatpush3.bf16.msra.mxu1 %v846_v52 }
 0x105   :  { %788 = vmatprep.subr.bf16.mxu1 %v856_v0 }
 0x108   :  { %789 = vmatpush3.bf16.msra.mxu1 %v847_v53 }
 0x1ab   :  { %v268_v43 = vpop.f32.mrf.mxu1 }
 0x1ac   :  { %v269_v44 = vadd.f32 %v633_v42, %v268_v43 }
 0x1ad   :  { %v752_v46 = vpop.f32.mrf.mxu1 }
 0x1ae   :  { %v274_v47 = vmax.f32 %v269_v44, 0.0 }
 0x1af   :  { %v271_v48 = vpop.f32.mrf.mxu1 }
 0x1b0   :  { %v276_v49 = vmul.f32 %v275_v45, %v274_v47 }
 0x1b1   :  { %v753_v50 = vpop.f32.mrf.mxu1 }
 0x1b2   :  { %v277_v51 = vpack.c.bf16 %v276_v49, %v276_v49 }
 0x1b4   :  { %771 = vmatmul.mubr.bf16.vlgmr.msra.gmra.mxu0 %v277_v51 }
 0x1b5   :  { %810 = vmatprep.mubr.msk.bf16.mxu0 %vm857_vm0, %v856_v0  ;;  %795 = vmatpush3.bf16.msra.mxu0 %v848_v54 }
 0x1b6   :  { %796 = vmatprep.subr.bf16.mxu0 %v856_v0 }
 0x1b9   :  { %797 = vmatpush3.bf16.msra.mxu0 %v849_v55 }
 0x1ba   :  { %798 = vmatprep.subr.bf16.mxu0 %v856_v0 }
 0x1bd   :  { %799 = vmatpush3.bf16.msra.mxu0 %v850_v56 }
 0x1be   :  { %800 = vmatprep.subr.bf16.mxu0 %v856_v0 }
 0x1c1   :  { %801 = vmatpush3.bf16.msra.mxu0 %v851_v57 }
 0x1c2   :  { %802 = vmatprep.subr.bf16.mxu0 %v856_v0 }
 0x1c5   :  { %803 = vmatpush3.bf16.msra.mxu0 %v852_v58 }
 0x1c6   :  { %804 = vmatprep.subr.bf16.mxu0 %v856_v0 }
 0x1c9   :  { %805 = vmatpush3.bf16.msra.mxu0 %v853_v59 }
 0x1ca   :  { %806 = vmatprep.subr.bf16.mxu0 %v856_v0 }
 0x1cd   :  { %807 = vmatpush3.bf16.msra.mxu0 %v854_v60 }
 0x1ce   :  { %808 = vmatprep.subr.bf16.mxu0 %v856_v0  ;;  %v651_v0 = vld [vmem:[%s1144_s10] ss:$0 sm:$0xff] }
 0x1d1   :  { %809 = vmatpush3.bf16.msra.mxu0 %v855_v6 }
 0x274   :  { %v383_v62 = vpop.f32.mrf.mxu0 }
 0x275   :  { %v384_v63 = vadd.f32 %v642_v61, %v383_v62 }
 0x276   :  { %v772_v1 = vpop.f32.mrf.mxu0 }
 0x277   :  { %v389_v2 = vmax.f32 %v384_v63, 0.0 }
 0x278   :  { %v386_v3 = vpop.f32.mrf.mxu0 }
 0x279   :  { %v390_v4 = vpack.c.bf16 %v389_v2, %v389_v2 }
 0x27a   :  { %v773_v5 = vpop.f32.mrf.mxu0 }
 0x27b   :  { %791 = vmatmul.mubr.bf16.vlgmr.msra.gmra.mxu1 %v390_v4 }
 0x33b   :  { %v496_v7 = vpop.f32.mrf.mxu1 }
 0x33c   :  { %v497_v8 = vadd.f32 %v651_v0, %v496_v7 }
 0x33d   :  { %v792_v9 = vpop.f32.mrf.mxu1 }
 0x33e   :  { %502 = vst [vmem:[%s1145_s13] sm:$0xff] %v497_v8  ;;  %v503_v10 = vpack.c.bf16 %v497_v8, %v497_v8 }
 0x33f   :  { %v499_v11 = vpop.f32.mrf.mxu1 }
 0x340   :  { %811 = vmatmul.mubr.bf16.vlgmr.msra.gmra.mxu0 %v503_v10 }
 0x341   :  { %v793_v12 = vpop.f32.mrf.mxu1 }
 0x400   :  { %v609_v14 = vpop.f32.mrf.mxu0 }
 0x401   :  { %v610_v15 = vadd.f32 %v660_v13, %v609_v14 }
 0x402   :  { %v812_v16 = vpop.f32.mrf.mxu0 }
 0x403   :  { %615 = vst [vmem:[%s1147_s14] sm:$0xff] %v610_v15 }
 0x404   :  { %v612_v17 = vpop.f32.mrf.mxu0 }
 0x406   :  { %v813_v18 = vpop.f32.mrf.mxu0 }

</bundles_post_ra>
